<compile_context>
chip_gen: v5e
topology: v5e:2x2
jax: 0.10.0
libtpu: 0.0.40
codegen_flags: <defaults>
</compile_context>

<pallas_src>
import functools

import numpy as np

import jax
import jax.numpy as jnp
from jax import lax
from jax.experimental import pallas as pl
from jax.experimental.pallas import tpu as pltpu

K = 7          # conv kernel size
PAD = K // 2   # = 3


def _ta_kernel(x_ref, m_ref, o_ref, *, shift):
    """One (Nb, C, HW) slab per grid step.

    x_ref : VMEM (Nb, C, HW)        input slab (lane-dense, native dtype)
    m_ref : VMEM (2*HW, HW) bf16    stacked conv-as-matmul matrix (BN scale folded)
    o_ref : VMEM (Nb, C, HW)        output slab
    shift : Python float            folded BatchNorm shift (compile-time)
    """
    x = x_ref[...]                                            # native dtype

    # Channel-wise mean / max (dim=1 of NCHW).  Only the reduction runs in f32;
    # the full slab is never upcast/copied.
    avg = jnp.mean(x.astype(jnp.float32), axis=1)             # (Nb, HW) f32
    mx = jnp.max(x, axis=1).astype(jnp.float32)               # (Nb, HW) f32

    # 7x7 zero-padded conv (2 -> 1 channel) with the BN scale folded in, as a
    # single bf16 MXU matmul against the stacked Toeplitz matrix:
    #   [avg ; max] (Nb, 2*HW) @ M (2*HW, HW) -> (Nb, HW), f32 accumulation.
    cat = jnp.concatenate([avg, mx], axis=-1).astype(jnp.bfloat16)
    conv = jnp.dot(cat, m_ref[...], preferred_element_type=jnp.float32)

    # Folded BN shift + sigmoid (EUP), then gate the input in its own dtype.
    attn = jax.nn.sigmoid(conv + shift)                       # (Nb, HW) f32
    o_ref[...] = (x * attn.astype(x.dtype)[:, None, :]).astype(o_ref.dtype)


def _conv_as_matmul_matrix(conv_w, scale, H, W, dtype=jnp.bfloat16):
    """Stacked dense matrix M (2*H*W, H*W) such that, for the flattened
    channel-mean plane a and channel-max plane b (each (H*W,)),

        (concat([a, b]) @ M)[h*W + w] == scale * conv7x7_zeropad([a; b])[h, w]

    Host-side preprocessing (weights are static at inference time)."""
    w = np.asarray(conv_w, dtype=np.float32).reshape(2, K, K) * np.float32(scale)
    M = np.zeros((2, H, W, H, W), dtype=np.float32)           # [c, y, x, h, w]
    for ki in range(K):
        dy = ki - PAD
        hs = np.arange(max(0, -dy), min(H, H - dy))            # valid output rows
        for kj in range(K):
            dx = kj - PAD
            ws = np.arange(max(0, -dx), min(W, W - dx))         # valid output cols
            for c in range(2):
                M[c, hs[:, None] + dy, ws[None, :] + dx,
                  hs[:, None], ws[None, :]] = w[c, ki, kj]
    return jnp.asarray(M.reshape(2 * H * W, H * W), dtype=dtype)


def _vmem_capacity_bytes():
    try:
        return int(pltpu.get_tpu_info().vmem_capacity_bytes)   # 64 MiB v7x, 128 MiB v5e/v6e
    except Exception:
        return 64 * 1024 * 1024                                 # conservative (v7x) fallback


def _pick_block_n(N, C, HW, itemsize, m_bytes, budget_bytes):
    """Largest batch-block whose (double-buffered) in/out slabs + resident conv
    matrix + f32 temporaries fit the VMEM budget, while keeping >= 2 grid steps
    (preferably an even count) when N > 1 so both v7x TensorCores get work.
    N need not divide evenly: the grid uses ceiling division and the padded
    tail block's writes are discarded (batch rows are independent)."""
    sub = (8 * 4) // itemsize                      # sublane tile: 8 f32 / 16 bf16
    c_pad = -(-C // sub) * sub                     # VMEM tile pads C to a sublane tile
    per_n = 4 * c_pad * HW * itemsize + 8 * HW * 4  # 2x in + 2x out blocks + f32 temps
    cap = max(1, int((budget_bytes - m_bytes) // per_n))
    nb = max(1, min(cap, N))
    if N > 1:
        nb = min(nb, -(-N // 2))                   # grid >= 2: one share per TensorCore
    while nb > 1 and pl.cdiv(N, nb) % 2 == 1:      # prefer an even grid (megacore)
        nb -= 1
    return max(1, nb)


def triplet_attention(x, conv_w, gamma, beta, running_mean, running_var, eps=1e-5):
    """x: (N, C, H, W); conv_w: (1, 2, K, K); BN params: scalars (eval mode).

    TODO(synk): PyTorch BatchNorm2d in *training* mode would use batch
    statistics of the conv output; this kernel implements eval-mode
    (running-stats) semantics, and concretizes weights/BN params host-side
    (static-weight inference only)."""
    N, C, H, W = x.shape
    HW = H * W

    # Fold eval-mode BatchNorm: scale into the conv matrix, shift into a
    # compile-time scalar added before the sigmoid.
    scale = float(gamma) / float(np.sqrt(float(running_var) + eps))
    shift = float(beta) - float(running_mean) * scale
    m = _conv_as_matmul_matrix(conv_w, scale, H, W)            # (2*HW, HW) bf16
    m_bytes = int(m.size) * int(m.dtype.itemsize)

    # Lane-dense layout for the reductions, the gate multiply and the stores.
    x_flat = x.reshape(N, C, HW)

    vmem_cap = _vmem_capacity_bytes()
    budget = vmem_cap // 2
    nb = _pick_block_n(N, C, HW, x.dtype.itemsize, 2 * m_bytes, budget)
    grid = (pl.cdiv(N, nb),)
    vmem_limit = int(min(int(vmem_cap * 0.9), budget + 2 * m_bytes + (4 << 20)))

    kernel = functools.partial(_ta_kernel, shift=shift)

    cost = pl.CostEstimate(
        flops=int(N * (2 * (2 * HW) * HW + 4 * C * HW)),
        transcendentals=int(N * HW),
        bytes_accessed=int(2 * N * C * HW * x.dtype.itemsize + m_bytes),
    )

    def call(m_spec):
        return pl.pallas_call(
            kernel,
            out_shape=jax.ShapeDtypeStruct((N, C, HW), x.dtype),
            grid=grid,
            in_specs=[
                pl.BlockSpec((nb, C, HW), lambda n: (n, 0, 0)),   # x slab
                m_spec,                                           # conv matrix (grid-invariant)
            ],
            out_specs=pl.BlockSpec((nb, C, HW), lambda n: (n, 0, 0)),
            compiler_params=pltpu.CompilerParams(
                dimension_semantics=("parallel",),
                vmem_limit_bytes=vmem_limit,
            ),
            cost_estimate=cost,
        )(x_flat, m)

    try:
        # Single-buffer the grid-invariant conv matrix (no second VMEM copy).
        m_spec = pl.BlockSpec((2 * HW, HW), lambda n: (0, 0),
                              pipeline_mode=pl.Buffered(1))
        out_flat = jax.block_until_ready(call(m_spec))
    except Exception:
        # Fallback: default (double-buffered) pipeline; block index is still
        # grid-invariant so the matrix is only DMA'd once.
        m_spec = pl.BlockSpec((2 * HW, HW), lambda n: (0, 0))
        out_flat = call(m_spec)

    return out_flat.reshape(N, C, H, W)


def triplet_attention_ref(x, conv_w, gamma, beta, running_mean, running_var, eps=1e-5):
    """Pure-JAX reference mirroring the PyTorch forward (eval-mode BN)."""
    avg = jnp.mean(x, axis=1, keepdims=True)
    mx = jnp.max(x, axis=1, keepdims=True)
    cat = jnp.concatenate([avg, mx], axis=1)                   # (N, 2, H, W)
    conv = lax.conv_general_dilated(
        cat, conv_w, window_strides=(1, 1), padding=[(PAD, PAD), (PAD, PAD)],
        dimension_numbers=("NCHW", "OIHW", "NCHW"),
        precision=lax.Precision.HIGHEST)
    bn = (conv - running_mean) / jnp.sqrt(running_var + eps) * gamma + beta
    attn = jax.nn.sigmoid(bn)
    return x * attn


if __name__ == "__main__":
    key = jax.random.PRNGKey(0)
    k_x, k_w, k_g, k_b = jax.random.split(key, 4)

    N, C, H, W = 2, 4, 16, 16
    x = jax.random.normal(k_x, (N, C, H, W), dtype=jnp.float32)

    # Conv2d(2, 1, kernel_size=7, padding=3, bias=False): uniform init.
    fan_in = 2 * K * K
    bound = 1.0 / float(np.sqrt(fan_in))
    conv_w = jax.random.uniform(k_w, (1, 2, K, K), jnp.float32, -bound, bound)

    # BatchNorm2d(1) parameters (deterministic, eval-mode semantics).
    gamma = jnp.float32(1.0) + 0.1 * jax.random.normal(k_g, (), jnp.float32)
    beta = 0.1 * jax.random.normal(k_b, (), jnp.float32)
    running_mean = jnp.float32(0.0)
    running_var = jnp.float32(1.0)

    out = triplet_attention(x, conv_w, gamma, beta, running_mean, running_var)
    out = jax.block_until_ready(out)

    ref = triplet_attention_ref(x, conv_w, gamma, beta, running_mean, running_var)
    assert out.shape == x.shape and out.dtype == x.dtype
    # Single-pass bf16 MXU conv (per perf review) -> slightly looser tolerance
    # than the previous f32/HIGHEST version; the conv only feeds a sigmoid gate.
    assert jnp.allclose(out, ref, atol=1e-2, rtol=1e-2), "mismatch vs reference"

    print("KERNEL_OK")
</pallas_src>

<mosaic_0001>
module attributes {stable_mosaic.version = 11 : i64} {
  func.func @_ta_kernel(%arg0: i32, %arg1: memref<1x4x256xf32, #tpu.memory_space<vmem>>, %arg2: memref<512x256xbf16, #tpu.memory_space<vmem>>, %arg3: memref<1x4x256xf32, #tpu.memory_space<vmem>>) attributes {dimension_semantics = [#tpu.dimension_semantics<parallel>], iteration_bounds = array<i64: 2>, scalar_prefetch = 0 : i64, scratch_operands = 0 : i64, tpu.core_type = #tpu.core_type<tc>, window_params = [{transform_indices = @transform_0, window_bounds = array<i64: 1, 4, 256>}, {pipeline_mode = #tpu.pipeline_mode<synchronous>, transform_indices = @transform_1, window_bounds = array<i64: 512, 256>}, {transform_indices = @transform_2, window_bounds = array<i64: 1, 4, 256>}]} {
    %c0 = arith.constant 0 : index
    %c0_0 = arith.constant 0 : index
    %c0_1 = arith.constant 0 : index
    %0 = vector.load %arg1[%c0, %c0_0, %c0_1] : memref<1x4x256xf32, #tpu.memory_space<vmem>>, vector<1x4x256xf32>
    %cst = arith.constant dense<0.000000e+00> : vector<1x256xf32>
    %1 = vector.multi_reduction <add>, %0, %cst [1] : vector<1x4x256xf32> to vector<1x256xf32>
    %cst_2 = arith.constant 4.000000e+00 : f32
    %2 = vector.broadcast %cst_2 : f32 to vector<1x256xf32>
    %3 = arith.divf %1, %2 : vector<1x256xf32>
    %cst_3 = arith.constant dense<0xFF800000> : vector<1x256xf32>
    %4 = vector.multi_reduction <maximumf>, %0, %cst_3 [1] : vector<1x4x256xf32> to vector<1x256xf32>
    %5 = tpu.concatenate %3, %4 in 1 : vector<1x256xf32>, vector<1x256xf32> -> vector<1x512xf32>
    %6 = arith.truncf %5 : vector<1x512xf32> to vector<1x512xbf16>
    %c0_4 = arith.constant 0 : index
    %c0_5 = arith.constant 0 : index
    %7 = vector.load %arg2[%c0_4, %c0_5] : memref<512x256xbf16, #tpu.memory_space<vmem>>, vector<512x256xbf16>
    %cst_6 = arith.constant dense<0.000000e+00> : vector<1x256xf32>
    %8 = tpu.matmul %6, %7, %cst_6 {dimension_numbers = #tpu.dot_dimension_numbers<[1], [0], [0], [1], [0, 0, 1, 1], [], []>} : vector<1x512xbf16>, vector<512x256xbf16>, vector<1x256xf32> -> vector<1x256xf32>
    %cst_7 = arith.constant -0.0621943585 : f32
    %9 = vector.broadcast %cst_7 : f32 to vector<1x256xf32>
    %10 = arith.addf %8, %9 : vector<1x256xf32>
    %11 = arith.negf %10 : vector<1x256xf32>
    %12 = math.exp %11 : vector<1x256xf32>
    %cst_8 = arith.constant 1.000000e+00 : f32
    %13 = vector.broadcast %cst_8 : f32 to vector<1x256xf32>
    %14 = arith.addf %13, %12 : vector<1x256xf32>
    %15 = arith.divf %13, %14 : vector<1x256xf32>
    %16 = vector.shape_cast %15 : vector<1x256xf32> to vector<1x1x256xf32>
    %17 = vector.broadcast %16 : vector<1x1x256xf32> to vector<1x4x256xf32>
    %18 = arith.mulf %0, %17 : vector<1x4x256xf32>
    %c0_9 = arith.constant 0 : index
    %c0_10 = arith.constant 0 : index
    %c0_11 = arith.constant 0 : index
    %19 = vector.load %arg3[%c0_9, %c0_10, %c0_11] : memref<1x4x256xf32, #tpu.memory_space<vmem>>, vector<1x4x256xf32>
    tpu.vector_store %arg3[%c0_9, %c0_10, %c0_11], %18 {strides = array<i32>} : memref<1x4x256xf32, #tpu.memory_space<vmem>>, vector<1x4x256xf32>,
    return
  }
  func.func @transform_0(%arg0: i32) -> (i32, i32, i32) {
    %c0_i32 = arith.constant 0 : i32
    %c0_i32_0 = arith.constant 0 : i32
    %c0_i32_1 = arith.constant 0 : i32
    return %arg0, %c0_i32, %c0_i32_0 : i32, i32, i32
  }
  func.func @transform_1(%arg0: i32) -> (i32, i32) {
    %c0_i32 = arith.constant 0 : i32
    %c0_i32_0 = arith.constant 0 : i32
    %c0_i32_1 = arith.constant 0 : i32
    return %c0_i32, %c0_i32_0 : i32, i32
  }
  func.func @transform_2(%arg0: i32) -> (i32, i32, i32) {
    %c0_i32 = arith.constant 0 : i32
    %c0_i32_0 = arith.constant 0 : i32
    %c0_i32_1 = arith.constant 0 : i32
    return %arg0, %c0_i32, %c0_i32_0 : i32, i32, i32
  }
}

module attributes {stable_mosaic.version = 11 : i64} {
  func.func @_ta_kernel(%arg0: i32, %arg1: memref<1x4x256xf32, #tpu.memory_space<vmem>>, %arg2: memref<512x256xbf16, #tpu.memory_space<vmem>>, %arg3: memref<1x4x256xf32, #tpu.memory_space<vmem>>) attributes {dimension_semantics = [#tpu.dimension_semantics<parallel>], iteration_bounds = array<i64: 2>, scalar_prefetch = 0 : i64, scratch_operands = 0 : i64, tpu.core_type = #tpu.core_type<tc>, window_params = [{transform_indices = @transform_0, window_bounds = array<i64: 1, 4, 256>}, {pipeline_mode = #tpu.pipeline_mode<synchronous>, transform_indices = @transform_1, window_bounds = array<i64: 512, 256>}, {transform_indices = @transform_2, window_bounds = array<i64: 1, 4, 256>}]} {
    %c0 = arith.constant 0 : index
    %c0_0 = arith.constant 0 : index
    %c0_1 = arith.constant 0 : index
    %0 = vector.load %arg1[%c0, %c0_0, %c0_1] : memref<1x4x256xf32, #tpu.memory_space<vmem>>, vector<1x4x256xf32>
    %cst = arith.constant dense<0.000000e+00> : vector<1x256xf32>
    %1 = vector.multi_reduction <add>, %0, %cst [1] : vector<1x4x256xf32> to vector<1x256xf32>
    %cst_2 = arith.constant 4.000000e+00 : f32
    %2 = vector.broadcast %cst_2 : f32 to vector<1x256xf32>
    %3 = arith.divf %1, %2 : vector<1x256xf32>
    %cst_3 = arith.constant dense<0xFF800000> : vector<1x256xf32>
    %4 = vector.multi_reduction <maximumf>, %0, %cst_3 [1] : vector<1x4x256xf32> to vector<1x256xf32>
    %5 = tpu.concatenate %3, %4 in 1 : vector<1x256xf32>, vector<1x256xf32> -> vector<1x512xf32>
    %6 = arith.truncf %5 : vector<1x512xf32> to vector<1x512xbf16>
    %c0_4 = arith.constant 0 : index
    %c0_5 = arith.constant 0 : index
    %7 = vector.load %arg2[%c0_4, %c0_5] : memref<512x256xbf16, #tpu.memory_space<vmem>>, vector<512x256xbf16>
    %cst_6 = arith.constant dense<0.000000e+00> : vector<1x256xf32>
    %8 = tpu.matmul %6, %7, %cst_6 {dimension_numbers = #tpu.dot_dimension_numbers<[1], [0], [0], [1], [0, 0, 1, 1], [], []>} : vector<1x512xbf16>, vector<512x256xbf16>, vector<1x256xf32> -> vector<1x256xf32>
    %cst_7 = arith.constant -0.0621943585 : f32
    %9 = vector.broadcast %cst_7 : f32 to vector<1x256xf32>
    %10 = arith.addf %8, %9 : vector<1x256xf32>
    %11 = arith.negf %10 : vector<1x256xf32>
    %12 = math.exp %11 : vector<1x256xf32>
    %cst_8 = arith.constant 1.000000e+00 : f32
    %13 = vector.broadcast %cst_8 : f32 to vector<1x256xf32>
    %14 = arith.addf %13, %12 : vector<1x256xf32>
    %15 = arith.divf %13, %14 : vector<1x256xf32>
    %16 = vector.shape_cast %15 : vector<1x256xf32> to vector<1x1x256xf32>
    %17 = vector.broadcast %16 : vector<1x1x256xf32> to vector<1x4x256xf32>
    %18 = arith.mulf %0, %17 : vector<1x4x256xf32>
    %c0_9 = arith.constant 0 : index
    %c0_10 = arith.constant 0 : index
    %c0_11 = arith.constant 0 : index
    %19 = vector.load %arg3[%c0_9, %c0_10, %c0_11] : memref<1x4x256xf32, #tpu.memory_space<vmem>>, vector<1x4x256xf32>
    tpu.vector_store %arg3[%c0_9, %c0_10, %c0_11], %18 {strides = array<i32>} : memref<1x4x256xf32, #tpu.memory_space<vmem>>, vector<1x4x256xf32>,
    return
  }
  func.func @transform_0(%arg0: i32) -> (i32, i32, i32) {
    %c0_i32 = arith.constant 0 : i32
    %c0_i32_0 = arith.constant 0 : i32
    %c0_i32_1 = arith.constant 0 : i32
    return %arg0, %c0_i32, %c0_i32_0 : i32, i32, i32
  }
  func.func @transform_1(%arg0: i32) -> (i32, i32) {
    %c0_i32 = arith.constant 0 : i32
    %c0_i32_0 = arith.constant 0 : i32
    %c0_i32_1 = arith.constant 0 : i32
    return %c0_i32, %c0_i32_0 : i32, i32
  }
  func.func @transform_2(%arg0: i32) -> (i32, i32, i32) {
    %c0_i32 = arith.constant 0 : i32
    %c0_i32_0 = arith.constant 0 : i32
    %c0_i32_1 = arith.constant 0 : i32
    return %arg0, %c0_i32, %c0_i32_0 : i32, i32, i32
  }
}

</mosaic_0001>

<bundles_post_ra>
// kernel: tpu_custom_call.1
= control target key start
LH: loop header
LB: loop body
LE: loop exit
PB: predicated region body
PF: predicated region fallthrough
CT: control target
= control target key end

     0   :  { %7 = vsyncpa [#allocation3], 0  ;;  %s1594_s0 = inlined_call_operand.hbm [shape: f32[2,4,256], index: 0, kind: input, shape index: {}]   ;;  %s1595_s1 = inlined_call_operand.hbm [shape: bf16[512,256], index: 1, kind: input, shape index: {}]   ;;  %s1596_s2 = inlined_call_operand.hbm [shape: f32[2,4,256], index: 2, kind: output, shape index: {}]  }
   0x1   :  { %9 = vsyncpa [#allocation3 + $0x1], 0 }
   0x2   :  { %10 = vsyncpa [#allocation6], 0 }
   0x3   :  { %11 = vsyncpa [#allocation4], 0 }
   0x4   :  { %13 = vsyncpa [#allocation4 + $0x1], 0  ;;  %s1426_s9 = smov 0   ;;  %s1428_s10 = smov 0  }
   0x5   :  { %s1430_s11 = smov 0   ;;  %s1432_s12 = smov 0  }
   0x6 LB: > { %s108_s15 = sshll.u32 %s1595_s1, 4  ;;  %s1450_s16 = sadd.s32 4294967295, %s1405_s12   ;;  %s1405_s12 = sphi %s1432_s12, %s1608_s12   ;;  %s1401_s11 = sphi %s1430_s11, %s1607_s11   ;;  %s1397_s10 = sphi %s1428_s10, %s1606_s10   ;;  %s1393_s9 = sphi %s1426_s9, %s1605_s9   ;;  %s109_s15 = int_to_ptr.hbm [resolvable:$true] %s108_s15 }
   0x7   : > { %p866_p0 = scmp.ge.s32.totalorder %s1405_s12, 1  ;;  %p40_p1 = scmp.eq.s32.totalorder %s1450_s16, 0 }
   0x8   : > { %p97_p2 = scmp.lt.s32.totalorder %s1405_s12, 3  ;;  %s1407_s18 = smov [#allocation5]  }
   0x9   : > { %s110_s19 = sshll.u32 %s1407_s18, 4  ;;  %s1408_s20 = smov 128   ;;  %s111_s19 = int_to_ptr.vmem [resolvable:$true] %s110_s19 }
   0xa   : > { %p1455_p3 = pnand %p866_p0, %p97_p2  ;;  %s1409_s21 = smov 8  }
   0xb   : > { %s865_s22 = sadd.s32 4294967294, %s1405_s12   ;;  %s1466_s23 = sadd.s32 1, %s1405_s12  }
   0xc   : > { %p1213_p4 = pneg %p1455_p3  ;;  %s26_s24 = sadd.s32 1, %s1401_s11 }
   0xd   : > { %s23_s25 = ssub.s32 %s1405_s12, %s1466_s23  ;;  %p33_p7 = scmp.ne.s32.totalorder %s1401_s11, %s1397_s10 }
   0xe   : > { %p1214_p6 = pnand %p1213_p4, %p40_p1  ;;  %p24_p8 = scmp.eq.s32.totalorder %s23_s25, 0 }
   0xf   : > { %p34_p9 = scmp.eq.s32.totalorder %s1405_s12, 0  ;;  %p39_p10 = scmp.ne.s32.totalorder %s1397_s10, %s1393_s9 }
  0x10   : > { %1216 = dma.hbm_to_vmem [thread:$0]  (!%p1214_p6), %s109_s15, 8192, %s111_s19, [#allocation6], %s1408_s20, %s1408_s20, %s1409_s21  }
  0x11   : > { %p84_p11 = scmp.eq.s32.totalorder %s1450_s16, 1  ;;  %p1482_p12 = por %p40_p1, %p39_p10 }
  0x12   : > { %s1478_s26 = scalar_select %p24_p8, %s1401_s11, %s26_s24  }
  0x13   : > { %p1486_p13 = por %p84_p11, %p33_p7  ;;  %p90_p0 = scmp.eq.s32.totalorder %s865_s22, 1 }
  0x14   : > { %p35_p2 = por %p34_p9, %p33_p7  ;;  %s124_s29 = sand.u32 1, %s1401_s11  }
  0x15   : > { %p1491_p4 = por %p90_p0, %p39_p10  ;;  %p1226_p6 = scmp.lt.s32.totalorder %s1405_s12, 2 }
  0x16   : > { %s869_s3 = sshll.u32 %s124_s29, 3  ;;  %s1139_s4 = sshll.u32 %s1405_s12, 3 }
  0x17   : > { %s133_s7 = scalar_lea.hbm %s1594_s0, %s1139_s4  ;;  %s128_s13 = scalar_lea.vmem [#allocation2], %s869_s3 }
  0x18   : > { %s135_s8 = sshll.u32 %s133_s7, 4  ;;  %s137_s14 = sshll.u32 %s128_s13, 4  ;;  %s136_s8 = int_to_ptr.hbm [resolvable:$true] %s135_s8  ;;  %s138_s14 = int_to_ptr.vmem [resolvable:$true] %s137_s14 }
  0x19   : > { %p1500_p8 = pnand %p1226_p6, %p35_p2  ;;  %s125_s18 = scalar_lea.sflag [#allocation3], %s124_s29 }
  0x1a   : > { %s1305_s19 = sshra.s32 %s136_s8, 4  ;;  %s1312_s24 = scalar_lea.hbm %s1594_s0, 16  ;;  %s1306_s19 = int_to_ptr.hbm [resolvable:$true] %s1305_s19 }
  0x1b   : > { %s1307_s20 = scalar_lea.hbm %s1306_s19, 8  ;;  %p1309_p9 = pneg %p1500_p8 }
  0x1c   : > { %p1308_p7 = scmp.ne.s32.totalorder %s1306_s19, %s1307_s20  ;;  %p1313_p0 = scmp.lt.s32.totalorder %s1306_s19, %s1594_s0 }
  0x1d   : > { %p1314_p2 = scmp.lt.s32.totalorder %s1312_s24, %s1307_s20 }
  0x1e   : > { %p1310_p10 = pnand %p1309_p9, %p1308_p7 }
  0x1f   : > { %p1315_p6 = por %p1314_p2, %p1313_p0 }
  0x20   : > { %p1311_p11 = pneg %p1310_p10 }
  0x22   : > { %p1316_p5 = pnand %p1315_p6, %p1311_p11 }
  0x24   : > { %1319 = shalt.err (!%p1316_p5)
}
  0x25   : > { %1220 = dma.hbm_to_vmem [thread:$0]  (!%p1500_p8), %s136_s8, 128, %s138_s14, %s125_s18  }
  0x26   : > { %146 = sbr.rel (%p1455_p3) target bundleno = 290 (0x122), region = 28  ;;  %s1517_s29 = sand.u32 (!%p1455_p3), 1, %s1397_s10  }
  0x27   : > { %s873_s4 = sshll.u32 (!%p1455_p3), %s1517_s29, 3  ;;  %s149_s5 = scalar_lea.sflag (!%p1455_p3), [#allocation3], %s1517_s29 }
  0x28   : > { %s1523_s6 = scalar_lea.vmem (!%p1455_p3), [#allocation2], %s873_s4 }
  0x2b   : > { %1380 = dma.done.wait (%p1482_p12), %s149_s5, 128  }
  0x2c   : > { %1382 = vsyncadd (%p1482_p12), %s149_s5, 4294967168 }
  0x2d   : > { %1384 = dma.done.wait (%p40_p1), [#allocation6], 8192  }
  0x2e   : > { %1386 = vsyncadd (%p40_p1), [#allocation6], 4294959104  ;;  %v934_v0 = vld [vmem:[#allocation5 + $0x70] sm:$0xf]  ;;  %v1155_v1 = vld [vmem:[#allocation5 + $0x74] sm:$0xf0] }
  0x2f   : > { %v998_v2 = vld [vmem:[#allocation5 + $0xf0] sm:$0xf]  ;;  %v935_v3 = vor.u32 %v1155_v1, %v934_v0  ;;  %v1171_v4 = vld [vmem:[#allocation5 + $0xf4] sm:$0xf0]  ;;  %v926_v11 = vld [vmem:[#allocation5 + $0x60] sm:$0xf] }
  0x30   : > { %v1062_v5 = vld [vmem:[#allocation5 + $0x170] sm:$0xf]  ;;  %v1187_v6 = vld [vmem:[#allocation5 + $0x174] sm:$0xf0]  ;;  %v999_v7 = vor.u32 %v1171_v4, %v998_v2  ;;  %v1153_v13 = vld [vmem:[#allocation5 + $0x64] sm:$0xf0] }
  0x31   : > { %v1063_v8 = vor.u32 %v1187_v6, %v1062_v5  ;;  %v1126_v9 = vld [vmem:[#allocation5 + $0x1f0] sm:$0xf]  ;;  %v1203_v10 = vld [vmem:[#allocation5 + $0x1f4] sm:$0xf0]  ;;  %617 = vmatpush.bf16.msra.mxu0 %v935_v3  ;;  %v990_v14 = vld [vmem:[#allocation5 + $0xe0] sm:$0xf]  ;;  %v927_v16 = vor.u32 %v1153_v13, %v926_v11 }
  0x32   : > { %v1127_v12 = vor.u32 %v1203_v10, %v1126_v9  ;;  %v1169_v15 = vld [vmem:[#allocation5 + $0xe4] sm:$0xf0]  ;;  %630 = vmatpush.bf16.msra.mxu1 %v999_v7  ;;  %v1054_v18 = vld [vmem:[#allocation5 + $0x160] sm:$0xf]  ;;  %v918_v23 = vld [vmem:[#allocation5 + $0x50] sm:$0xf] }
  0x33   : > { %643 = vmatpush.bf16.msra.mxu2 %v1063_v8  ;;  %v991_v17 = vor.u32 %v1169_v15, %v990_v14  ;;  %v1185_v19 = vld [vmem:[#allocation5 + $0x164] sm:$0xf0]  ;;  %v1118_v20 = vld [vmem:[#allocation5 + $0x1e0] sm:$0xf]  ;;  %v1151_v24 = vld [vmem:[#allocation5 + $0x54] sm:$0xf0] }
  0x34   : > { %656 = vmatpush.bf16.msra.mxu3 %v1127_v12  ;;  %v1055_v21 = vor.u32 %v1185_v19, %v1054_v18  ;;  %v1201_v22 = vld [vmem:[#allocation5 + $0x1e4] sm:$0xf0]  ;;  %v982_v26 = vld [vmem:[#allocation5 + $0xd0] sm:$0xf]  ;;  %v1167_v27 = vld [vmem:[#allocation5 + $0xd4] sm:$0xf0]  ;;  %v919_v29 = vor.u32 %v1151_v24, %v918_v23 }
  0x35   : > { %v1119_v25 = vor.u32 %v1201_v22, %v1118_v20  ;;  %v1046_v28 = vld [vmem:[#allocation5 + $0x150] sm:$0xf]  ;;  %618 = vmatpush.bf16.msra.mxu0 %v927_v16  ;;  %v1183_v30 = vld [vmem:[#allocation5 + $0x154] sm:$0xf0]  ;;  %v983_v33 = vor.u32 %v1167_v27, %v982_v26  ;;  %v910_v35 = vld [vmem:[#allocation5 + $0x40] sm:$0xf] }
  0x36   : > { %v1110_v31 = vld [vmem:[#allocation5 + $0x1d0] sm:$0xf]  ;;  %v1199_v32 = vld [vmem:[#allocation5 + $0x1d4] sm:$0xf0]  ;;  %631 = vmatpush.bf16.msra.mxu1 %v991_v17  ;;  %v1047_v34 = vor.u32 %v1183_v30, %v1046_v28  ;;  %v1149_v36 = vld [vmem:[#allocation5 + $0x44] sm:$0xf0] }
  0x37   : > { %644 = vmatpush.bf16.msra.mxu2 %v1055_v21  ;;  %v974_v37 = vld [vmem:[#allocation5 + $0xc0] sm:$0xf]  ;;  %v1111_v38 = vor.u32 %v1199_v32, %v1110_v31  ;;  %v1165_v39 = vld [vmem:[#allocation5 + $0xc4] sm:$0xf0]  ;;  %v911_v44 = vor.u32 %v1149_v36, %v910_v35  ;;  %v902_v47 = vld [vmem:[#allocation5 + $0x30] sm:$0xf] }
  0x38   : > { %657 = vmatpush.bf16.msra.mxu3 %v1119_v25  ;;  %v1038_v40 = vld [vmem:[#allocation5 + $0x140] sm:$0xf]  ;;  %v1181_v41 = vld [vmem:[#allocation5 + $0x144] sm:$0xf0]  ;;  %v975_v45 = vor.u32 %v1165_v39, %v974_v37  ;;  %v1147_v48 = vld [vmem:[#allocation5 + $0x34] sm:$0xf0] }
  0x39   : > { %v1102_v42 = vld [vmem:[#allocation5 + $0x1c0] sm:$0xf]  ;;  %v1197_v43 = vld [vmem:[#allocation5 + $0x1c4] sm:$0xf0]  ;;  %619 = vmatpush.bf16.msra.mxu0 %v919_v29  ;;  %v1039_v46 = vor.u32 %v1181_v41, %v1038_v40  ;;  %v966_v49 = vld [vmem:[#allocation5 + $0xb0] sm:$0xf]  ;;  %v903_v56 = vor.u32 %v1147_v48, %v902_v47 }
  0x3a   : > { %632 = vmatpush.bf16.msra.mxu1 %v983_v33  ;;  %v1103_v50 = vor.u32 %v1197_v43, %v1102_v42  ;;  %v1163_v51 = vld [vmem:[#allocation5 + $0xb4] sm:$0xf0]  ;;  %v1030_v52 = vld [vmem:[#allocation5 + $0x130] sm:$0xf]  ;;  %v894_v59 = vld [vmem:[#allocation5 + $0x20] sm:$0xf] }
  0x3b   : > { %645 = vmatpush.bf16.msra.mxu2 %v1047_v34  ;;  %v1179_v53 = vld [vmem:[#allocation5 + $0x134] sm:$0xf0]  ;;  %v1094_v54 = vld [vmem:[#allocation5 + $0x1b0] sm:$0xf]  ;;  %v967_v57 = vor.u32 %v1163_v51, %v966_v49  ;;  %v1145_v60 = vld [vmem:[#allocation5 + $0x24] sm:$0xf0] }
  0x3c   : > { %658 = vmatpush.bf16.msra.mxu3 %v1111_v38  ;;  %v1195_v55 = vld [vmem:[#allocation5 + $0x1b4] sm:$0xf0]  ;;  %v1031_v58 = vor.u32 %v1179_v53, %v1030_v52  ;;  %v958_v61 = vld [vmem:[#allocation5 + $0xa0] sm:$0xf]  ;;  %v1161_v63 = vld [vmem:[#allocation5 + $0xa4] sm:$0xf0]  ;;  %v895_v4 = vor.u32 %v1145_v60, %v894_v59 }
  0x3d   : > { %620 = vmatpush.bf16.msra.mxu0 %v911_v44  ;;  %v1095_v62 = vor.u32 %v1195_v55, %v1094_v54  ;;  %v1022_v0 = vld [vmem:[#allocation5 + $0x120] sm:$0xf]  ;;  %v1177_v1 = vld [vmem:[#allocation5 + $0x124] sm:$0xf0]  ;;  %v959_v5 = vor.u32 %v1161_v63, %v958_v61  ;;  %v886_v7 = vld [vmem:[#allocation5 + $0x10] sm:$0xf] }
  0x3e   : > { %633 = vmatpush.bf16.msra.mxu1 %v975_v45  ;;  %v1086_v2 = vld [vmem:[#allocation5 + $0x1a0] sm:$0xf]  ;;  %v1193_v3 = vld [vmem:[#allocation5 + $0x1a4] sm:$0xf0]  ;;  %v1023_v6 = vor.u32 %v1177_v1, %v1022_v0  ;;  %v1143_v8 = vld [vmem:[#allocation5 + $0x14] sm:$0xf0] }
  0x3f   : > { %646 = vmatpush.bf16.msra.mxu2 %v1039_v46  ;;  %v950_v9 = vld [vmem:[#allocation5 + $0x90] sm:$0xf]  ;;  %v1087_v10 = vor.u32 %v1193_v3, %v1086_v2  ;;  %v1159_v11 = vld [vmem:[#allocation5 + $0x94] sm:$0xf0]  ;;  %v878_v16 = vld [vmem:[#allocation5] sm:$0xf]  ;;  %v887_v17 = vor.u32 %v1143_v8, %v886_v7 }
  0x40   : > { %659 = vmatpush.bf16.msra.mxu3 %v1103_v50  ;;  %v1014_v12 = vld [vmem:[#allocation5 + $0x110] sm:$0xf]  ;;  %v1175_v13 = vld [vmem:[#allocation5 + $0x114] sm:$0xf0]  ;;  %v1141_v18 = vld [vmem:[#allocation5 + $0x4] sm:$0xf0]  ;;  %v951_v21 = vor.u32 %v1159_v11, %v950_v9 }
  0x41   : > { %621 = vmatpush.bf16.msra.mxu0 %v903_v56  ;;  %v1078_v14 = vld [vmem:[#allocation5 + $0x190] sm:$0xf]  ;;  %v1191_v15 = vld [vmem:[#allocation5 + $0x194] sm:$0xf0]  ;;  %v942_v19 = vld [vmem:[#allocation5 + $0x80] sm:$0xf]  ;;  %v1015_v22 = vor.u32 %v1175_v13, %v1014_v12  ;;  %v879_v33 = vor.u32 %v1141_v18, %v878_v16 }
  0x42   : > { %634 = vmatpush.bf16.msra.mxu1 %v967_v57  ;;  %v1157_v20 = vld [vmem:[#allocation5 + $0x84] sm:$0xf0]  ;;  %v1006_v23 = vld [vmem:[#allocation5 + $0x100] sm:$0xf]  ;;  %v1534_v25 = vld [vmem:[%s1523_s6] sm:$0xff]  ;;  %v1079_v26 = vor.u32 %v1191_v15, %v1078_v14  ;;  %v1410_v29 = vmov 4.0  }
  0x43   : > { %647 = vmatpush.bf16.msra.mxu2 %v1031_v58  ;;  %v1173_v24 = vld [vmem:[#allocation5 + $0x104] sm:$0xf0]  ;;  %v1070_v27 = vld [vmem:[#allocation5 + $0x180] sm:$0xf]  ;;  %181 = vst [vmem:[#allocation1] ss:$2 sm:$0xff] %v1534_v25  ;;  %1265 = vrcp.f32 %v1410_v29  ;;  %v943_v37 = vor.u32 %v1157_v20, %v942_v19 }
  0x44   : > { %660 = vmatpush.bf16.msra.mxu3 %v1095_v62  ;;  %v1189_v28 = vld [vmem:[#allocation5 + $0x184] sm:$0xf0]  ;;  %v1154_v30 = vld [vmem:[#allocation5 + $0x74] sm:$0xf]  ;;  %v936_v31 = vld [vmem:[#allocation5 + $0x78] sm:$0xf0]  ;;  %v1007_v38 = vor.u32 %v1173_v24, %v1006_v23 }
  0x45   : > { %622 = vmatpush.bf16.msra.mxu0 %v895_v4  ;;  %v1170_v32 = vld [vmem:[#allocation5 + $0xf4] sm:$0xf]  ;;  %v1000_v34 = vld [vmem:[#allocation5 + $0xf8] sm:$0xf0]  ;;  %v1071_v41 = vor.u32 %v1189_v28, %v1070_v27  ;;  %v939_v42 = vor.u32 %v1154_v30, %v936_v31  ;;  %vm186_vm0 = vcmask 1043456   ;;  %s1204_s17 = sshll.u32 %s1450_s16, 3 }
  0x46   : > { %635 = vmatpush.bf16.msra.mxu1 %v959_v5  ;;  %v1186_v35 = vld [vmem:[#allocation5 + $0x174] sm:$0xf]  ;;  %v1064_v36 = vld [vmem:[#allocation5 + $0x178] sm:$0xf0]  ;;  %v1152_v43 = vld [vmem:[#allocation5 + $0x64] sm:$0xf]  ;;  %v1003_v45 = vor.u32 %v1170_v32, %v1000_v34  ;;  %s780_s8 = scalar_lea.hbm %s1596_s2, %s1204_s17 }
  0x47   : > { %648 = vmatpush.bf16.msra.mxu2 %v1023_v6  ;;  %v1202_v39 = vld [vmem:[#allocation5 + $0x1f4] sm:$0xf]  ;;  %v1128_v40 = vld [vmem:[#allocation5 + $0x1f8] sm:$0xf0]  ;;  %v928_v44 = vld [vmem:[#allocation5 + $0x68] sm:$0xf0]  ;;  %v1067_v46 = vor.u32 %v1186_v35, %v1064_v36 }
  0x48   : > { %661 = vmatpush.bf16.msra.mxu3 %v1087_v10  ;;  %v1168_v47 = vld [vmem:[#allocation5 + $0xe4] sm:$0xf]  ;;  %v992_v48 = vld [vmem:[#allocation5 + $0xe8] sm:$0xf0]  ;;  %v1131_v51 = vor.u32 %v1202_v39, %v1128_v40  ;;  %v1150_v57 = vld [vmem:[#allocation5 + $0x54] sm:$0xf]  ;;  %v931_v61 = vor.u32 %v1152_v43, %v928_v44 }
  0x49   : > { %623 = vmatpush.bf16.msra.mxu0 %v887_v17  ;;  %v1184_v49 = vld [vmem:[#allocation5 + $0x164] sm:$0xf]  ;;  %v1537_v50 = vpop.eup %1265  ;;  %v1056_v52 = vld [vmem:[#allocation5 + $0x168] sm:$0xf0]  ;;  %v920_v58 = vld [vmem:[#allocation5 + $0x58] sm:$0xf0]  ;;  %v995_v0 = vor.u32 %v1168_v47, %v992_v48 }
  0x4a   : > { %636 = vmatpush.bf16.msra.mxu1 %v951_v21  ;;  %v1200_v53 = vld [vmem:[#allocation5 + $0x1e4] sm:$0xf]  ;;  %v1120_v54 = vld [vmem:[#allocation5 + $0x1e8] sm:$0xf0]  ;;  %v202_v60 = vmul.f32 4.0, %v1537_v50  ;;  %v1059_v1 = vor.u32 %v1184_v49, %v1056_v52  ;;  %v923_v15 = vor.u32 %v1150_v57, %v920_v58  ;;  %vm206_vm1 = vweird.f32 %v1537_v50  ;;  %s178_s13 = scalar_lea.vmem [#allocation7], %s873_s4 }
  0x4b   : > { %649 = vmatpush.bf16.msra.mxu2 %v1015_v22  ;;  %v182_v55 = vld.sshfl [vmem:[#allocation1] sm:$0xff pattern:$0x75316420]  ;;  %v183_v56 = vld.sshfl [vmem:[#allocation1 + $0x8] sm:$0xff pattern:$0x75316420]  ;;  %v1123_v6 = vor.u32 %v1200_v53, %v1120_v54 }
  0x4c   : > { %662 = vmatpush.bf16.msra.mxu3 %v1079_v26  ;;  %210 = vst [vmem:[#allocation1] ss:$2 sm:$0xff] %v1534_v25  ;;  %v187_v59 = vsel %vm186_vm0, %v182_v55, 0.0  ;;  %v194_v62 = vsel %vm186_vm0, %v183_v56, 0.0  ;;  %v1166_v3 = vld [vmem:[#allocation5 + $0xd4] sm:$0xf] }
  0x4d   : > { %624 = vmatpush.bf16.msra.mxu0 %v879_v33  ;;  %v188_v63 = vrot.slane %v187_v59, 4  ;;  %v195_v2 = vrot.slane %v194_v62, 4  ;;  %v984_v4 = vld [vmem:[#allocation5 + $0xd8] sm:$0xf0]  ;;  %v203_v5 = vsub.f32 1.0, %v202_v60  ;;  %s782_s14 = sshll.u32 %s178_s13, 4  ;;  %s783_s14 = int_to_ptr.vmem [resolvable:$true] %s782_s14 }
  0x4e   : > { %637 = vmatpush.bf16.msra.mxu1 %v943_v37  ;;  %v1182_v7 = vld [vmem:[#allocation5 + $0x154] sm:$0xf]  ;;  %v1048_v8 = vld [vmem:[#allocation5 + $0x158] sm:$0xf0]  ;;  %v1148_v13 = vld [vmem:[#allocation5 + $0x44] sm:$0xf]  ;;  %v987_v21 = vor.u32 %v1166_v3, %v984_v4 }
  0x4f   : > { %650 = vmatpush.bf16.msra.mxu2 %v1007_v38  ;;  %v189_v9 = vadd.f32 %v188_v63, %v187_v59  ;;  %v196_v10 = vadd.f32 %v195_v2, %v194_v62  ;;  %v1198_v11 = vld [vmem:[#allocation5 + $0x1d4] sm:$0xf]  ;;  %v1112_v12 = vld [vmem:[#allocation5 + $0x1d8] sm:$0xf0]  ;;  %v204_v14 = vmul.f32 %v1537_v50, %v203_v5  ;;  %v912_v16 = vld [vmem:[#allocation5 + $0x48] sm:$0xf0]  ;;  %v1051_v22 = vor.u32 %v1182_v7, %v1048_v8 }
  0x50   : > { %663 = vmatpush.bf16.msra.mxu3 %v1071_v41  ;;  %v1164_v17 = vld [vmem:[#allocation5 + $0xc4] sm:$0xf]  ;;  %v976_v18 = vld [vmem:[#allocation5 + $0xc8] sm:$0xf0]  ;;  %v1115_v27 = vor.u32 %v1198_v11, %v1112_v12  ;;  %v915_v34 = vor.u32 %v1148_v13, %v912_v16  ;;  %v1146_v39 = vld [vmem:[#allocation5 + $0x34] sm:$0xf] }
  0x51   : > { %669 = vmatpush.bf16.msrb.mxu0 %v939_v42  ;;  %v190_v19 = vrot.slane %v189_v9, 2  ;;  %v197_v20 = vrot.slane %v196_v10, 2  ;;  %v1180_v23 = vld [vmem:[#allocation5 + $0x144] sm:$0xf]  ;;  %v1040_v24 = vld [vmem:[#allocation5 + $0x148] sm:$0xf0]  ;;  %v205_v26 = vadd.f32 %v1537_v50, %v204_v14  ;;  %v979_v37 = vor.u32 %v1164_v17, %v976_v18 }
  0x52   : > { %682 = vmatpush.bf16.msrb.mxu1 %v1003_v45  ;;  %v1196_v28 = vld [vmem:[#allocation5 + $0x1c4] sm:$0xf]  ;;  %v1104_v29 = vld [vmem:[#allocation5 + $0x1c8] sm:$0xf0]  ;;  %v1043_v38 = vor.u32 %v1180_v23, %v1040_v24  ;;  %v904_v44 = vld [vmem:[#allocation5 + $0x38] sm:$0xf0] }
  0x53   : > { %695 = vmatpush.bf16.msrb.mxu2 %v1067_v46  ;;  %v211_v30 = vld.sshfl [vmem:[#allocation1] sm:$0xff pattern:$0x75316420]  ;;  %v191_v31 = vadd.f32 %v190_v19, %v189_v9  ;;  %v212_v32 = vld.sshfl [vmem:[#allocation1 + $0x8] sm:$0xff pattern:$0x75316420]  ;;  %v198_v33 = vadd.f32 %v197_v20, %v196_v10  ;;  %v207_v45 = vsel %vm206_vm1, %v1537_v50, %v205_v26  ;;  %v1107_v46 = vor.u32 %v1196_v28, %v1104_v29 }
  0x54   : > { %708 = vmatpush.bf16.msrb.mxu3 %v1131_v51  ;;  %v215_v35 = vsel %vm186_vm0, %v211_v30, -inf  ;;  %v222_v36 = vsel %vm186_vm0, %v212_v32, -inf  ;;  %v1162_v47 = vld [vmem:[#allocation5 + $0xb4] sm:$0xf]  ;;  %v968_v48 = vld [vmem:[#allocation5 + $0xb8] sm:$0xf0]  ;;  %v907_v58 = vor.u32 %v1146_v39, %v904_v44 }
  0x55   : > { %670 = vmatpush.bf16.msrb.mxu0 %v931_v61  ;;  %v216_v40 = vrot.slane %v215_v35, 4  ;;  %v192_v41 = vrot.slane %v191_v31, 1  ;;  %v223_v42 = vrot.slane %v222_v36, 4  ;;  %v199_v43 = vrot.slane %v198_v33, 1  ;;  %v1178_v49 = vld [vmem:[#allocation5 + $0x134] sm:$0xf] }
  0x56   : > { %683 = vmatpush.bf16.msrb.mxu1 %v995_v0  ;;  %v1032_v55 = vld [vmem:[#allocation5 + $0x138] sm:$0xf0]  ;;  %v1194_v56 = vld [vmem:[#allocation5 + $0x1b4] sm:$0xf]  ;;  %v1144_v50 = vld [vmem:[#allocation5 + $0x24] sm:$0xf]  ;;  %v971_v0 = vor.u32 %v1162_v47, %v968_v48 }
  0x57   : > { %696 = vmatpush.bf16.msrb.mxu2 %v1059_v1  ;;  %v217_v51 = vmax.f32 %v215_v35, %v216_v40  ;;  %v193_v52 = vadd.f32 %v192_v41, %v191_v31  ;;  %v224_v53 = vmax.f32 %v222_v36, %v223_v42  ;;  %v200_v54 = vadd.f32 %v199_v43, %v198_v33  ;;  %v1096_v57 = vld [vmem:[#allocation5 + $0x1b8] sm:$0xf0]  ;;  %v896_v63 = vld [vmem:[#allocation5 + $0x28] sm:$0xf0]  ;;  %v1160_v3 = vld [vmem:[#allocation5 + $0xa4] sm:$0xf] }
  0x58   : > { %709 = vmatpush.bf16.msrb.mxu3 %v1123_v6  ;;  %v1035_v1 = vor.u32 %v1178_v49, %v1032_v55  ;;  %v1099_v2 = vor.u32 %v1194_v56, %v1096_v57  ;;  %v960_v8 = vld [vmem:[#allocation5 + $0xa8] sm:$0xf0]  ;;  %v1176_v9 = vld [vmem:[#allocation5 + $0x124] sm:$0xf]  ;;  %v899_v11 = vor.u32 %v1144_v50, %v896_v63  ;;  %v1142_v16 = vld [vmem:[#allocation5 + $0x14] sm:$0xf] }
  0x59   : > { %671 = vmatpush.bf16.msrb.mxu0 %v923_v15  ;;  %v218_v59 = vrot.slane %v217_v51, 2  ;;  %v208_v60 = vmul.f32 %v207_v45, %v193_v52  ;;  %v225_v61 = vrot.slane %v224_v53, 2  ;;  %v209_v62 = vmul.f32 %v207_v45, %v200_v54  ;;  %v1024_v10 = vld [vmem:[#allocation5 + $0x128] sm:$0xf0]  ;;  %v1192_v12 = vld [vmem:[#allocation5 + $0x1a4] sm:$0xf] }
  0x5a   : > { %684 = vmatpush.bf16.msrb.mxu1 %v987_v21  ;;  %v1088_v13 = vld [vmem:[#allocation5 + $0x1a8] sm:$0xf0]  ;;  %v888_v17 = vld [vmem:[#allocation5 + $0x18] sm:$0xf0]  ;;  %v963_v18 = vor.u32 %v1160_v3, %v960_v8  ;;  %v1027_v19 = vor.u32 %v1176_v9, %v1024_v10  ;;  %v1158_v20 = vld [vmem:[#allocation5 + $0x94] sm:$0xf] }
  0x5b   : > { %697 = vmatpush.bf16.msrb.mxu2 %v1051_v22  ;;  %v219_v4 = vmax.f32 %v217_v51, %v218_v59  ;;  %v229_v5 = vpack.c.bf16 %v208_v60, %v208_v60  ;;  %v226_v6 = vmax.f32 %v224_v53, %v225_v61  ;;  %v230_v7 = vpack.c.bf16 %v209_v62, %v209_v62  ;;  %v952_v23 = vld [vmem:[#allocation5 + $0x98] sm:$0xf0]  ;;  %v1174_v24 = vld [vmem:[#allocation5 + $0x114] sm:$0xf]  ;;  %v1140_v33 = vld [vmem:[#allocation5 + $0x4] sm:$0xf] }
  0x5c   : > { %710 = vmatpush.bf16.msrb.mxu3 %v1115_v27  ;;  %v1016_v26 = vld [vmem:[#allocation5 + $0x118] sm:$0xf0]  ;;  %v1091_v27 = vor.u32 %v1192_v12, %v1088_v13  ;;  %v891_v28 = vor.u32 %v1142_v16, %v888_v17  ;;  %v1190_v29 = vld [vmem:[#allocation5 + $0x194] sm:$0xf]  ;;  %v955_v35 = vor.u32 %v1158_v20, %v952_v23  ;;  %v1172_v39 = vld [vmem:[#allocation5 + $0x104] sm:$0xf] }
  0x5d   : > { %672 = vmatpush.bf16.msrb.mxu0 %v915_v34  ;;  %v220_v14 = vrot.slane %v219_v4, 1  ;;  %v227_v15 = vrot.slane %v226_v6, 1  ;;  %638 = vmatmul.bf16.vlgmr.msra.gmra.mxu1 %v230_v7  ;;  %v1080_v32 = vld [vmem:[#allocation5 + $0x198] sm:$0xf0]  ;;  %v880_v34 = vld [vmem:[#allocation5 + $0x8] sm:$0xf0]  ;;  %v1019_v36 = vor.u32 %v1174_v24, %v1016_v26 }
  0x5e   : > { %685 = vmatpush.bf16.msrb.mxu1 %v979_v37  ;;  %625 = vmatmul.bf16.vlgmr.msra.gmra.mxu0 %v229_v5  ;;  %v1156_v37 = vld [vmem:[#allocation5 + $0x84] sm:$0xf]  ;;  %v1008_v40 = vld [vmem:[#allocation5 + $0x108] sm:$0xf0]  ;;  %v1083_v41 = vor.u32 %v1190_v29, %v1080_v32  ;;  %v883_v42 = vor.u32 %v1140_v33, %v880_v34  ;;  %s784_s15 = sshll.u32 %s780_s8, 4  ;;  %s769_s16 = scalar_lea.sflag [#allocation4], %s1517_s29  ;;  %s785_s15 = int_to_ptr.hbm [resolvable:$true] %s784_s15 }
  0x5f   : > { %698 = vmatpush.bf16.msrb.mxu2 %v1043_v38  ;;  %v221_v21 = vmax.f32 %v219_v4, %v220_v14  ;;  %v228_v22 = vmax.f32 %v226_v6, %v227_v15  ;;  %v944_v38 = vld [vmem:[#allocation5 + $0x88] sm:$0xf0]  ;;  %v1188_v43 = vld [vmem:[#allocation5 + $0x184] sm:$0xf]  ;;  %s1349_s18 = sshra.s32 %s785_s15, 4  ;;  %s1355_s22 = scalar_lea.hbm %s1596_s2, 16  ;;  %s1350_s18 = int_to_ptr.hbm [resolvable:$true] %s1349_s18 }
  0x60   : > { %711 = vmatpush.bf16.msrb.mxu3 %v1107_v46  ;;  %v1072_v44 = vld [vmem:[#allocation5 + $0x188] sm:$0xf0]  ;;  %v947_v45 = vor.u32 %v1156_v37, %v944_v38  ;;  %v1011_v46 = vor.u32 %v1172_v39, %v1008_v40  ;;  %s1351_s19 = scalar_lea.hbm %s1350_s18, 8  ;;  %p1356_p12 = scmp.lt.s32.totalorder %s1350_s18, %s1596_s2 }
  0x61   : > { %673 = vmatpush.bf16.msrb.mxu0 %v907_v58  ;;  %v231_v30 = vpack.c.bf16 %v221_v21, %v221_v21  ;;  %v232_v31 = vpack.c.bf16 %v228_v22, %v228_v22  ;;  %v1075_v47 = vor.u32 %v1188_v43, %v1072_v44  ;;  %p1352_p1 = scmp.ne.s32.totalorder %s1350_s18, %s1351_s19  ;;  %p1357_p8 = scmp.lt.s32.totalorder %s1355_s22, %s1351_s19 }
  0x62   : > { %686 = vmatpush.bf16.msrb.mxu1 %v971_v0 }
  0x63   : > { %699 = vmatpush.bf16.msrb.mxu2 %v1035_v1  ;;  %664 = vmatmul.bf16.vlgmr.msra.gmra.mxu3 %v232_v31  ;;  %p1353_p3 = pnand %p1352_p1, %p1486_p13  ;;  %p1358_p7 = por %p1357_p8, %p1356_p12 }
  0x64   : > { %712 = vmatpush.bf16.msrb.mxu3 %v1099_v2  ;;  %651 = vmatmul.bf16.vlgmr.msra.gmra.mxu2 %v231_v30 }
  0x65   : > { %674 = vmatpush.bf16.msrb.mxu0 %v899_v11  ;;  %p1354_p5 = pneg %p1353_p3 }
  0x66   : > { %687 = vmatpush.bf16.msrb.mxu1 %v963_v18 }
  0x67   : > { %700 = vmatpush.bf16.msrb.mxu2 %v1027_v19  ;;  %p1359_p9 = pnand %p1358_p7, %p1354_p5 }
  0x68   : > { %713 = vmatpush.bf16.msrb.mxu3 %v1091_v27 }
  0x69   : > { %675 = vmatpush.bf16.msrb.mxu0 %v891_v28 }
  0x6a   : > { %688 = vmatpush.bf16.msrb.mxu1 %v955_v35 }
  0x6b   : > { %701 = vmatpush.bf16.msrb.mxu2 %v1019_v36 }
  0x6c   : > { %714 = vmatpush.bf16.msrb.mxu3 %v1083_v41 }
  0x6d   : > { %676 = vmatpush.bf16.msrb.mxu0 %v883_v42 }
  0x6e   : > { %689 = vmatpush.bf16.msrb.mxu1 %v947_v45 }
  0x6f   : > { %702 = vmatpush.bf16.msrb.mxu2 %v1011_v46 }
  0x70   : > { %715 = vmatpush.bf16.msrb.mxu3 %v1075_v47  ;;  %677 = vmatmul.bf16.vlgmr.msrb.gmra.mxu0 %v229_v5 }
  0x71   : > { %690 = vmatmul.bf16.vlgmr.msrb.gmra.mxu1 %v230_v7 }
  0x73   : > { %716 = vmatmul.bf16.vlgmr.msrb.gmra.mxu3 %v232_v31 }
  0x74   : > { %703 = vmatmul.bf16.vlgmr.msrb.gmra.mxu2 %v231_v30 }
  0xda   : > { %v639_v49 = vpop.f32.mrf.mxu1 }
  0xdb   : > { %v626_v48 = vpop.f32.mrf.mxu0 }
  0xdc   : > { %v627_v51 = vadd.f32 -0.06219436, %v626_v48 }
  0xde   : > { %v640_v54 = vadd.f32 %v639_v49, %v627_v51 }
  0xe2   : > { %v641_v53 = vpop.f32.mrf.mxu1 }
  0xe3   : > { %v628_v52 = vpop.f32.mrf.mxu0 }
  0xe6   : > { %v665_v56 = vpop.f32.mrf.mxu3 }
  0xe7   : > { %v652_v55 = vpop.f32.mrf.mxu2 }
  0xe8   : > { %v653_v57 = vadd.f32 %v652_v55, %v640_v54 }
  0xea   : > { %v666_v58 = vadd.f32 %v665_v56, %v653_v57 }
  0xec   : > { %v1132_v61 = vmul.f32 -1.442695, %v666_v58 }
  0xed   : > { %v678_v59 = vpop.f32.mrf.mxu0 }
  0xee   : > { %v691_v60 = vpop.f32.mrf.mxu1  ;;  %1267 = vpow2.f32 %v1132_v61  ;;  %v667_v50 = vpop.f32.mrf.mxu3  ;;  %v679_v63 = vadd.f32 -0.06219436, %v678_v59 }
  0xef   : > { %v654_v62 = vpop.f32.mrf.mxu2 }
  0xf0   : > { %v692_v3 = vadd.f32 %v691_v60, %v679_v63 }
  0xf4   : > { %v1268_v2 = vpop.eup %1267 }
  0xf5   : > { %v680_v0 = vpop.f32.mrf.mxu0  ;;  %v727_v4 = vadd.f32 1.0, %v1268_v2 }
  0xf6   : > { %v693_v1 = vpop.f32.mrf.mxu1  ;;  %v717_v6 = vpop.f32.mrf.mxu3 }
  0xf7   : > { %v704_v5 = vpop.f32.mrf.mxu2  ;;  %1269 = vrcp.f32 %v727_v4  ;;  %vm734_vm2 = vweird.f32 %v727_v4  ;;  %v740_v20 = vand.u32 2147483648, %v727_v4  ;;  %v738_v22 = vand.u32 2147483647, %v727_v4 }
  0xf8   : > { %v705_v7 = vadd.f32 %v704_v5, %v692_v3 }
  0xf9   : > { %v741_v29 = vor.u32 1.1754944e-38, %v740_v20  ;;  %vm739_vm6 = vcmp.eq.f32.partialorder %v738_v22, 8.507059e+37 }
  0xfa   : > { %v718_v8 = vadd.f32 %v717_v6, %v705_v7 }
  0xfc   : > { %v1133_v9 = vmul.f32 -1.442695, %v718_v8 }
  0xfd   : > { %v1270_v12 = vpop.eup %1269 }
  0xfe   : > { %1271 = vpow2.f32 %v1133_v9  ;;  %v719_v11 = vpop.f32.mrf.mxu3  ;;  %v730_v14 = vmul.f32 %v1270_v12, %v727_v4  ;;  %vm735_vm3 = vweird.f32 %v1270_v12 }
  0xff   : > { %v706_v10 = vpop.f32.mrf.mxu2  ;;  %vm1551_vm4 = vmor %vm734_vm2, %vm735_vm3 }
 0x100   : > { %v731_v16 = vsub.f32 1.0, %v730_v14 }
 0x102   : > { %v732_v17 = vmul.f32 %v1270_v12, %v731_v16 }
 0x104   : > { %v1272_v13 = vpop.eup %1271  ;;  %v733_v21 = vadd.f32 %v1270_v12, %v732_v17 }
 0x105   : > { %v728_v15 = vadd.f32 1.0, %v1272_v13 }
 0x106   : > { %v737_v31 = vsel %vm1551_vm4, %v1270_v12, %v733_v21 }
 0x107   : > { %1273 = vrcp.f32 %v728_v15  ;;  %v755_v26 = vand.u32 2147483648, %v728_v15  ;;  %v753_v28 = vand.u32 2147483647, %v728_v15  ;;  %vm749_vm7 = vweird.f32 %v728_v15 }
 0x108   : > { %v742_v34 = vsel %vm739_vm6, %v741_v29, %v737_v31 }
 0x109   : > { %v756_v32 = vor.u32 1.1754944e-38, %v755_v26  ;;  %vm754_vm9 = vcmp.eq.f32.partialorder %v753_v28, 8.507059e+37  ;;  %v759_v37 = vperm.slane %v742_v34, 0 }
 0x10d   : > { %v1274_v18 = vpop.eup %1273 }
 0x10e   : > { %v745_v19 = vmul.f32 %v1274_v18, %v728_v15  ;;  %vm750_vm5 = vweird.f32 %v1274_v18 }
 0x10f   : > { %vm751_vm8 = vmor %vm749_vm7, %vm750_vm5 }
 0x110   : > { %v746_v23 = vsub.f32 1.0, %v745_v19 }
 0x112   : > { %v747_v27 = vmul.f32 %v1274_v18, %v746_v23 }
 0x114   : > { %v748_v30 = vadd.f32 %v1274_v18, %v747_v27 }
 0x116   : > { %v752_v33 = vsel %vm751_vm8, %v1274_v18, %v748_v30 }
 0x117   : > { %v757_v35 = vsel %vm754_vm9, %v756_v32, %v752_v33 }
 0x118   : > { %v760_v36 = vperm.slane %v757_v35, 0 }
 0x11a   : > { %v763_v38 = vrot.slane %v760_v36, 4 }
 0x11c   : > { %v764_v39 = vsel %vm186_vm0, %v759_v37, %v763_v38 }
 0x11d   : > { %v766_v40 = vmul.f32 %v764_v39, %v1534_v25 }
 0x11f   : > { %767 = vst [vmem:[%s178_s13] sm:$0xff] %v766_v40 }
 0x120   : > { %1362 = shalt.err (!%p1359_p9)
}
 0x121   : > { %1211 = dma.vmem_to_hbm [thread:$0]  (%p1486_p13), %s783_s14, 128, %s785_s15, %s769_s16  }
 0x122 PF: > { %s796_s3 = sand.u32 1, %s1393_s9   ;;  %p1604_p10 = scmp.ge.s32.totalorder %s1405_s12, 2 }
 0x123   : > { %s797_s29 = scalar_lea.sflag [#allocation4], %s796_s3 }
 0x124   : > { %p1222_p11 = pnand %p1604_p10, %p1491_p4 }
 0x126   : > { %p1223_p0 = pneg %p1222_p11 }
 0x128   : > { %1388 = dma.done.wait (%p1223_p0), %s797_s29, 128  }
 0x129   : > { %1390 = vsyncadd (%p1223_p0), %s797_s29, 4294967168  ;;  %p16_p2 = scmp.ge.s32.totalorder %s1466_s23, 4   ;;  %s1605_s9 = smov %s1397_s10 }
 0x12a   : > { %s1606_s10 = smov %s1401_s11  ;;  %s1607_s11 = smov %s1478_s26 }
 0x12b   : > { %s1608_s12 = smov %s1466_s23  ;;  %18 = sbr.rel (!%p16_p2) target bundleno = 6 (0x6), region = 77 }
 0x130   :  { %803 = vsyncpa [#allocation3], 1 }
 0x131   :  { %805 = vsyncpa [#allocation3 + $0x1], 1 }
 0x132   :  { %806 = vsyncpa [#allocation6], 1 }
 0x133   :  { %807 = vsyncpa [#allocation4], 1 }
 0x134   :  { %809 = vsyncpa [#allocation4 + $0x1], 1 }

// kernel: tpu_custom_call.1
= control target key start
LH: loop header
LB: loop body
LE: loop exit
PB: predicated region body
PF: predicated region fallthrough
CT: control target
= control target key end

     0   :  { %7 = vsyncpa [#allocation3], 0  ;;  %s1594_s0 = inlined_call_operand.hbm [shape: f32[2,4,256], index: 0, kind: input, shape index: {}]   ;;  %s1595_s1 = inlined_call_operand.hbm [shape: bf16[512,256], index: 1, kind: input, shape index: {}]   ;;  %s1596_s2 = inlined_call_operand.hbm [shape: f32[2,4,256], index: 2, kind: output, shape index: {}]  }
   0x1   :  { %9 = vsyncpa [#allocation3 + $0x1], 0 }
   0x2   :  { %10 = vsyncpa [#allocation6], 0 }
   0x3   :  { %11 = vsyncpa [#allocation4], 0 }
   0x4   :  { %13 = vsyncpa [#allocation4 + $0x1], 0  ;;  %s1426_s9 = smov 0   ;;  %s1428_s10 = smov 0  }
   0x5   :  { %s1430_s11 = smov 0   ;;  %s1432_s12 = smov 0  }
   0x6 LB: > { %s108_s15 = sshll.u32 %s1595_s1, 4  ;;  %s1450_s16 = sadd.s32 4294967295, %s1405_s12   ;;  %s1405_s12 = sphi %s1432_s12, %s1608_s12   ;;  %s1401_s11 = sphi %s1430_s11, %s1607_s11   ;;  %s1397_s10 = sphi %s1428_s10, %s1606_s10   ;;  %s1393_s9 = sphi %s1426_s9, %s1605_s9   ;;  %s109_s15 = int_to_ptr.hbm [resolvable:$true] %s108_s15 }
   0x7   : > { %p866_p0 = scmp.ge.s32.totalorder %s1405_s12, 1  ;;  %p40_p1 = scmp.eq.s32.totalorder %s1450_s16, 0 }
   0x8   : > { %p97_p2 = scmp.lt.s32.totalorder %s1405_s12, 3  ;;  %s1407_s18 = smov [#allocation5]  }
   0x9   : > { %s110_s19 = sshll.u32 %s1407_s18, 4  ;;  %s1408_s20 = smov 128   ;;  %s111_s19 = int_to_ptr.vmem [resolvable:$true] %s110_s19 }
   0xa   : > { %p1455_p3 = pnand %p866_p0, %p97_p2  ;;  %s1409_s21 = smov 8  }
   0xb   : > { %s865_s22 = sadd.s32 4294967294, %s1405_s12   ;;  %s1466_s23 = sadd.s32 1, %s1405_s12  }
   0xc   : > { %p1213_p4 = pneg %p1455_p3  ;;  %s26_s24 = sadd.s32 1, %s1401_s11 }
   0xd   : > { %s23_s25 = ssub.s32 %s1405_s12, %s1466_s23  ;;  %p33_p7 = scmp.ne.s32.totalorder %s1401_s11, %s1397_s10 }
   0xe   : > { %p1214_p6 = pnand %p1213_p4, %p40_p1  ;;  %p24_p8 = scmp.eq.s32.totalorder %s23_s25, 0 }
   0xf   : > { %p34_p9 = scmp.eq.s32.totalorder %s1405_s12, 0  ;;  %p39_p10 = scmp.ne.s32.totalorder %s1397_s10, %s1393_s9 }
  0x10   : > { %1216 = dma.hbm_to_vmem [thread:$0]  (!%p1214_p6), %s109_s15, 8192, %s111_s19, [#allocation6], %s1408_s20, %s1408_s20, %s1409_s21  }
  0x11   : > { %p84_p11 = scmp.eq.s32.totalorder %s1450_s16, 1  ;;  %p1482_p12 = por %p40_p1, %p39_p10 }
  0x12   : > { %s1478_s26 = scalar_select %p24_p8, %s1401_s11, %s26_s24  }
  0x13   : > { %p1486_p13 = por %p84_p11, %p33_p7  ;;  %p90_p0 = scmp.eq.s32.totalorder %s865_s22, 1 }
  0x14   : > { %p35_p2 = por %p34_p9, %p33_p7  ;;  %s124_s29 = sand.u32 1, %s1401_s11  }
  0x15   : > { %p1491_p4 = por %p90_p0, %p39_p10  ;;  %p1226_p6 = scmp.lt.s32.totalorder %s1405_s12, 2 }
  0x16   : > { %s869_s3 = sshll.u32 %s124_s29, 3  ;;  %s1139_s4 = sshll.u32 %s1405_s12, 3 }
  0x17   : > { %s133_s7 = scalar_lea.hbm %s1594_s0, %s1139_s4  ;;  %s128_s13 = scalar_lea.vmem [#allocation2], %s869_s3 }
  0x18   : > { %s135_s8 = sshll.u32 %s133_s7, 4  ;;  %s137_s14 = sshll.u32 %s128_s13, 4  ;;  %s136_s8 = int_to_ptr.hbm [resolvable:$true] %s135_s8  ;;  %s138_s14 = int_to_ptr.vmem [resolvable:$true] %s137_s14 }
  0x19   : > { %p1500_p8 = pnand %p1226_p6, %p35_p2  ;;  %s125_s18 = scalar_lea.sflag [#allocation3], %s124_s29 }
  0x1a   : > { %s1305_s19 = sshra.s32 %s136_s8, 4  ;;  %s1312_s24 = scalar_lea.hbm %s1594_s0, 16  ;;  %s1306_s19 = int_to_ptr.hbm [resolvable:$true] %s1305_s19 }
  0x1b   : > { %s1307_s20 = scalar_lea.hbm %s1306_s19, 8  ;;  %p1309_p9 = pneg %p1500_p8 }
  0x1c   : > { %p1308_p7 = scmp.ne.s32.totalorder %s1306_s19, %s1307_s20  ;;  %p1313_p0 = scmp.lt.s32.totalorder %s1306_s19, %s1594_s0 }
  0x1d   : > { %p1314_p2 = scmp.lt.s32.totalorder %s1312_s24, %s1307_s20 }
  0x1e   : > { %p1310_p10 = pnand %p1309_p9, %p1308_p7 }
  0x1f   : > { %p1315_p6 = por %p1314_p2, %p1313_p0 }
  0x20   : > { %p1311_p11 = pneg %p1310_p10 }
  0x22   : > { %p1316_p5 = pnand %p1315_p6, %p1311_p11 }
  0x24   : > { %1319 = shalt.err (!%p1316_p5)
}
  0x25   : > { %1220 = dma.hbm_to_vmem [thread:$0]  (!%p1500_p8), %s136_s8, 128, %s138_s14, %s125_s18  }
  0x26   : > { %146 = sbr.rel (%p1455_p3) target bundleno = 290 (0x122), region = 28  ;;  %s1517_s29 = sand.u32 (!%p1455_p3), 1, %s1397_s10  }
  0x27   : > { %s873_s4 = sshll.u32 (!%p1455_p3), %s1517_s29, 3  ;;  %s149_s5 = scalar_lea.sflag (!%p1455_p3), [#allocation3], %s1517_s29 }
  0x28   : > { %s1523_s6 = scalar_lea.vmem (!%p1455_p3), [#allocation2], %s873_s4 }
  0x2b   : > { %1380 = dma.done.wait (%p1482_p12), %s149_s5, 128  }
  0x2c   : > { %1382 = vsyncadd (%p1482_p12), %s149_s5, 4294967168 }
  0x2d   : > { %1384 = dma.done.wait (%p40_p1), [#allocation6], 8192  }
  0x2e   : > { %1386 = vsyncadd (%p40_p1), [#allocation6], 4294959104  ;;  %v934_v0 = vld [vmem:[#allocation5 + $0x70] sm:$0xf]  ;;  %v1155_v1 = vld [vmem:[#allocation5 + $0x74] sm:$0xf0] }
  0x2f   : > { %v998_v2 = vld [vmem:[#allocation5 + $0xf0] sm:$0xf]  ;;  %v935_v3 = vor.u32 %v1155_v1, %v934_v0  ;;  %v1171_v4 = vld [vmem:[#allocation5 + $0xf4] sm:$0xf0]  ;;  %v926_v11 = vld [vmem:[#allocation5 + $0x60] sm:$0xf] }
  0x30   : > { %v1062_v5 = vld [vmem:[#allocation5 + $0x170] sm:$0xf]  ;;  %v1187_v6 = vld [vmem:[#allocation5 + $0x174] sm:$0xf0]  ;;  %v999_v7 = vor.u32 %v1171_v4, %v998_v2  ;;  %v1153_v13 = vld [vmem:[#allocation5 + $0x64] sm:$0xf0] }
  0x31   : > { %v1063_v8 = vor.u32 %v1187_v6, %v1062_v5  ;;  %v1126_v9 = vld [vmem:[#allocation5 + $0x1f0] sm:$0xf]  ;;  %v1203_v10 = vld [vmem:[#allocation5 + $0x1f4] sm:$0xf0]  ;;  %617 = vmatpush.bf16.msra.mxu0 %v935_v3  ;;  %v990_v14 = vld [vmem:[#allocation5 + $0xe0] sm:$0xf]  ;;  %v927_v16 = vor.u32 %v1153_v13, %v926_v11 }
  0x32   : > { %v1127_v12 = vor.u32 %v1203_v10, %v1126_v9  ;;  %v1169_v15 = vld [vmem:[#allocation5 + $0xe4] sm:$0xf0]  ;;  %630 = vmatpush.bf16.msra.mxu1 %v999_v7  ;;  %v1054_v18 = vld [vmem:[#allocation5 + $0x160] sm:$0xf]  ;;  %v918_v23 = vld [vmem:[#allocation5 + $0x50] sm:$0xf] }
  0x33   : > { %643 = vmatpush.bf16.msra.mxu2 %v1063_v8  ;;  %v991_v17 = vor.u32 %v1169_v15, %v990_v14  ;;  %v1185_v19 = vld [vmem:[#allocation5 + $0x164] sm:$0xf0]  ;;  %v1118_v20 = vld [vmem:[#allocation5 + $0x1e0] sm:$0xf]  ;;  %v1151_v24 = vld [vmem:[#allocation5 + $0x54] sm:$0xf0] }
  0x34   : > { %656 = vmatpush.bf16.msra.mxu3 %v1127_v12  ;;  %v1055_v21 = vor.u32 %v1185_v19, %v1054_v18  ;;  %v1201_v22 = vld [vmem:[#allocation5 + $0x1e4] sm:$0xf0]  ;;  %v982_v26 = vld [vmem:[#allocation5 + $0xd0] sm:$0xf]  ;;  %v1167_v27 = vld [vmem:[#allocation5 + $0xd4] sm:$0xf0]  ;;  %v919_v29 = vor.u32 %v1151_v24, %v918_v23 }
  0x35   : > { %v1119_v25 = vor.u32 %v1201_v22, %v1118_v20  ;;  %v1046_v28 = vld [vmem:[#allocation5 + $0x150] sm:$0xf]  ;;  %618 = vmatpush.bf16.msra.mxu0 %v927_v16  ;;  %v1183_v30 = vld [vmem:[#allocation5 + $0x154] sm:$0xf0]  ;;  %v983_v33 = vor.u32 %v1167_v27, %v982_v26  ;;  %v910_v35 = vld [vmem:[#allocation5 + $0x40] sm:$0xf] }
  0x36   : > { %v1110_v31 = vld [vmem:[#allocation5 + $0x1d0] sm:$0xf]  ;;  %v1199_v32 = vld [vmem:[#allocation5 + $0x1d4] sm:$0xf0]  ;;  %631 = vmatpush.bf16.msra.mxu1 %v991_v17  ;;  %v1047_v34 = vor.u32 %v1183_v30, %v1046_v28  ;;  %v1149_v36 = vld [vmem:[#allocation5 + $0x44] sm:$0xf0] }
  0x37   : > { %644 = vmatpush.bf16.msra.mxu2 %v1055_v21  ;;  %v974_v37 = vld [vmem:[#allocation5 + $0xc0] sm:$0xf]  ;;  %v1111_v38 = vor.u32 %v1199_v32, %v1110_v31  ;;  %v1165_v39 = vld [vmem:[#allocation5 + $0xc4] sm:$0xf0]  ;;  %v911_v44 = vor.u32 %v1149_v36, %v910_v35  ;;  %v902_v47 = vld [vmem:[#allocation5 + $0x30] sm:$0xf] }
  0x38   : > { %657 = vmatpush.bf16.msra.mxu3 %v1119_v25  ;;  %v1038_v40 = vld [vmem:[#allocation5 + $0x140] sm:$0xf]  ;;  %v1181_v41 = vld [vmem:[#allocation5 + $0x144] sm:$0xf0]  ;;  %v975_v45 = vor.u32 %v1165_v39, %v974_v37  ;;  %v1147_v48 = vld [vmem:[#allocation5 + $0x34] sm:$0xf0] }
  0x39   : > { %v1102_v42 = vld [vmem:[#allocation5 + $0x1c0] sm:$0xf]  ;;  %v1197_v43 = vld [vmem:[#allocation5 + $0x1c4] sm:$0xf0]  ;;  %619 = vmatpush.bf16.msra.mxu0 %v919_v29  ;;  %v1039_v46 = vor.u32 %v1181_v41, %v1038_v40  ;;  %v966_v49 = vld [vmem:[#allocation5 + $0xb0] sm:$0xf]  ;;  %v903_v56 = vor.u32 %v1147_v48, %v902_v47 }
  0x3a   : > { %632 = vmatpush.bf16.msra.mxu1 %v983_v33  ;;  %v1103_v50 = vor.u32 %v1197_v43, %v1102_v42  ;;  %v1163_v51 = vld [vmem:[#allocation5 + $0xb4] sm:$0xf0]  ;;  %v1030_v52 = vld [vmem:[#allocation5 + $0x130] sm:$0xf]  ;;  %v894_v59 = vld [vmem:[#allocation5 + $0x20] sm:$0xf] }
  0x3b   : > { %645 = vmatpush.bf16.msra.mxu2 %v1047_v34  ;;  %v1179_v53 = vld [vmem:[#allocation5 + $0x134] sm:$0xf0]  ;;  %v1094_v54 = vld [vmem:[#allocation5 + $0x1b0] sm:$0xf]  ;;  %v967_v57 = vor.u32 %v1163_v51, %v966_v49  ;;  %v1145_v60 = vld [vmem:[#allocation5 + $0x24] sm:$0xf0] }
  0x3c   : > { %658 = vmatpush.bf16.msra.mxu3 %v1111_v38  ;;  %v1195_v55 = vld [vmem:[#allocation5 + $0x1b4] sm:$0xf0]  ;;  %v1031_v58 = vor.u32 %v1179_v53, %v1030_v52  ;;  %v958_v61 = vld [vmem:[#allocation5 + $0xa0] sm:$0xf]  ;;  %v1161_v63 = vld [vmem:[#allocation5 + $0xa4] sm:$0xf0]  ;;  %v895_v4 = vor.u32 %v1145_v60, %v894_v59 }
  0x3d   : > { %620 = vmatpush.bf16.msra.mxu0 %v911_v44  ;;  %v1095_v62 = vor.u32 %v1195_v55, %v1094_v54  ;;  %v1022_v0 = vld [vmem:[#allocation5 + $0x120] sm:$0xf]  ;;  %v1177_v1 = vld [vmem:[#allocation5 + $0x124] sm:$0xf0]  ;;  %v959_v5 = vor.u32 %v1161_v63, %v958_v61  ;;  %v886_v7 = vld [vmem:[#allocation5 + $0x10] sm:$0xf] }
  0x3e   : > { %633 = vmatpush.bf16.msra.mxu1 %v975_v45  ;;  %v1086_v2 = vld [vmem:[#allocation5 + $0x1a0] sm:$0xf]  ;;  %v1193_v3 = vld [vmem:[#allocation5 + $0x1a4] sm:$0xf0]  ;;  %v1023_v6 = vor.u32 %v1177_v1, %v1022_v0  ;;  %v1143_v8 = vld [vmem:[#allocation5 + $0x14] sm:$0xf0] }
  0x3f   : > { %646 = vmatpush.bf16.msra.mxu2 %v1039_v46  ;;  %v950_v9 = vld [vmem:[#allocation5 + $0x90] sm:$0xf]  ;;  %v1087_v10 = vor.u32 %v1193_v3, %v1086_v2  ;;  %v1159_v11 = vld [vmem:[#allocation5 + $0x94] sm:$0xf0]  ;;  %v878_v16 = vld [vmem:[#allocation5] sm:$0xf]  ;;  %v887_v17 = vor.u32 %v1143_v8, %v886_v7 }
  0x40   : > { %659 = vmatpush.bf16.msra.mxu3 %v1103_v50  ;;  %v1014_v12 = vld [vmem:[#allocation5 + $0x110] sm:$0xf]  ;;  %v1175_v13 = vld [vmem:[#allocation5 + $0x114] sm:$0xf0]  ;;  %v1141_v18 = vld [vmem:[#allocation5 + $0x4] sm:$0xf0]  ;;  %v951_v21 = vor.u32 %v1159_v11, %v950_v9 }
  0x41   : > { %621 = vmatpush.bf16.msra.mxu0 %v903_v56  ;;  %v1078_v14 = vld [vmem:[#allocation5 + $0x190] sm:$0xf]  ;;  %v1191_v15 = vld [vmem:[#allocation5 + $0x194] sm:$0xf0]  ;;  %v942_v19 = vld [vmem:[#allocation5 + $0x80] sm:$0xf]  ;;  %v1015_v22 = vor.u32 %v1175_v13, %v1014_v12  ;;  %v879_v33 = vor.u32 %v1141_v18, %v878_v16 }
  0x42   : > { %634 = vmatpush.bf16.msra.mxu1 %v967_v57  ;;  %v1157_v20 = vld [vmem:[#allocation5 + $0x84] sm:$0xf0]  ;;  %v1006_v23 = vld [vmem:[#allocation5 + $0x100] sm:$0xf]  ;;  %v1534_v25 = vld [vmem:[%s1523_s6] sm:$0xff]  ;;  %v1079_v26 = vor.u32 %v1191_v15, %v1078_v14  ;;  %v1410_v29 = vmov 4.0  }
  0x43   : > { %647 = vmatpush.bf16.msra.mxu2 %v1031_v58  ;;  %v1173_v24 = vld [vmem:[#allocation5 + $0x104] sm:$0xf0]  ;;  %v1070_v27 = vld [vmem:[#allocation5 + $0x180] sm:$0xf]  ;;  %181 = vst [vmem:[#allocation1] ss:$2 sm:$0xff] %v1534_v25  ;;  %1265 = vrcp.f32 %v1410_v29  ;;  %v943_v37 = vor.u32 %v1157_v20, %v942_v19 }
  0x44   : > { %660 = vmatpush.bf16.msra.mxu3 %v1095_v62  ;;  %v1189_v28 = vld [vmem:[#allocation5 + $0x184] sm:$0xf0]  ;;  %v1154_v30 = vld [vmem:[#allocation5 + $0x74] sm:$0xf]  ;;  %v936_v31 = vld [vmem:[#allocation5 + $0x78] sm:$0xf0]  ;;  %v1007_v38 = vor.u32 %v1173_v24, %v1006_v23 }
  0x45   : > { %622 = vmatpush.bf16.msra.mxu0 %v895_v4  ;;  %v1170_v32 = vld [vmem:[#allocation5 + $0xf4] sm:$0xf]  ;;  %v1000_v34 = vld [vmem:[#allocation5 + $0xf8] sm:$0xf0]  ;;  %v1071_v41 = vor.u32 %v1189_v28, %v1070_v27  ;;  %v939_v42 = vor.u32 %v1154_v30, %v936_v31  ;;  %vm186_vm0 = vcmask 1043456   ;;  %s1204_s17 = sshll.u32 %s1450_s16, 3 }
  0x46   : > { %635 = vmatpush.bf16.msra.mxu1 %v959_v5  ;;  %v1186_v35 = vld [vmem:[#allocation5 + $0x174] sm:$0xf]  ;;  %v1064_v36 = vld [vmem:[#allocation5 + $0x178] sm:$0xf0]  ;;  %v1152_v43 = vld [vmem:[#allocation5 + $0x64] sm:$0xf]  ;;  %v1003_v45 = vor.u32 %v1170_v32, %v1000_v34  ;;  %s780_s8 = scalar_lea.hbm %s1596_s2, %s1204_s17 }
  0x47   : > { %648 = vmatpush.bf16.msra.mxu2 %v1023_v6  ;;  %v1202_v39 = vld [vmem:[#allocation5 + $0x1f4] sm:$0xf]  ;;  %v1128_v40 = vld [vmem:[#allocation5 + $0x1f8] sm:$0xf0]  ;;  %v928_v44 = vld [vmem:[#allocation5 + $0x68] sm:$0xf0]  ;;  %v1067_v46 = vor.u32 %v1186_v35, %v1064_v36 }
  0x48   : > { %661 = vmatpush.bf16.msra.mxu3 %v1087_v10  ;;  %v1168_v47 = vld [vmem:[#allocation5 + $0xe4] sm:$0xf]  ;;  %v992_v48 = vld [vmem:[#allocation5 + $0xe8] sm:$0xf0]  ;;  %v1131_v51 = vor.u32 %v1202_v39, %v1128_v40  ;;  %v1150_v57 = vld [vmem:[#allocation5 + $0x54] sm:$0xf]  ;;  %v931_v61 = vor.u32 %v1152_v43, %v928_v44 }
  0x49   : > { %623 = vmatpush.bf16.msra.mxu0 %v887_v17  ;;  %v1184_v49 = vld [vmem:[#allocation5 + $0x164] sm:$0xf]  ;;  %v1537_v50 = vpop.eup %1265  ;;  %v1056_v52 = vld [vmem:[#allocation5 + $0x168] sm:$0xf0]  ;;  %v920_v58 = vld [vmem:[#allocation5 + $0x58] sm:$0xf0]  ;;  %v995_v0 = vor.u32 %v1168_v47, %v992_v48 }
  0x4a   : > { %636 = vmatpush.bf16.msra.mxu1 %v951_v21  ;;  %v1200_v53 = vld [vmem:[#allocation5 + $0x1e4] sm:$0xf]  ;;  %v1120_v54 = vld [vmem:[#allocation5 + $0x1e8] sm:$0xf0]  ;;  %v202_v60 = vmul.f32 4.0, %v1537_v50  ;;  %v1059_v1 = vor.u32 %v1184_v49, %v1056_v52  ;;  %v923_v15 = vor.u32 %v1150_v57, %v920_v58  ;;  %vm206_vm1 = vweird.f32 %v1537_v50  ;;  %s178_s13 = scalar_lea.vmem [#allocation7], %s873_s4 }
  0x4b   : > { %649 = vmatpush.bf16.msra.mxu2 %v1015_v22  ;;  %v182_v55 = vld.sshfl [vmem:[#allocation1] sm:$0xff pattern:$0x75316420]  ;;  %v183_v56 = vld.sshfl [vmem:[#allocation1 + $0x8] sm:$0xff pattern:$0x75316420]  ;;  %v1123_v6 = vor.u32 %v1200_v53, %v1120_v54 }
  0x4c   : > { %662 = vmatpush.bf16.msra.mxu3 %v1079_v26  ;;  %210 = vst [vmem:[#allocation1] ss:$2 sm:$0xff] %v1534_v25  ;;  %v187_v59 = vsel %vm186_vm0, %v182_v55, 0.0  ;;  %v194_v62 = vsel %vm186_vm0, %v183_v56, 0.0  ;;  %v1166_v3 = vld [vmem:[#allocation5 + $0xd4] sm:$0xf] }
  0x4d   : > { %624 = vmatpush.bf16.msra.mxu0 %v879_v33  ;;  %v188_v63 = vrot.slane %v187_v59, 4  ;;  %v195_v2 = vrot.slane %v194_v62, 4  ;;  %v984_v4 = vld [vmem:[#allocation5 + $0xd8] sm:$0xf0]  ;;  %v203_v5 = vsub.f32 1.0, %v202_v60  ;;  %s782_s14 = sshll.u32 %s178_s13, 4  ;;  %s783_s14 = int_to_ptr.vmem [resolvable:$true] %s782_s14 }
  0x4e   : > { %637 = vmatpush.bf16.msra.mxu1 %v943_v37  ;;  %v1182_v7 = vld [vmem:[#allocation5 + $0x154] sm:$0xf]  ;;  %v1048_v8 = vld [vmem:[#allocation5 + $0x158] sm:$0xf0]  ;;  %v1148_v13 = vld [vmem:[#allocation5 + $0x44] sm:$0xf]  ;;  %v987_v21 = vor.u32 %v1166_v3, %v984_v4 }
  0x4f   : > { %650 = vmatpush.bf16.msra.mxu2 %v1007_v38  ;;  %v189_v9 = vadd.f32 %v188_v63, %v187_v59  ;;  %v196_v10 = vadd.f32 %v195_v2, %v194_v62  ;;  %v1198_v11 = vld [vmem:[#allocation5 + $0x1d4] sm:$0xf]  ;;  %v1112_v12 = vld [vmem:[#allocation5 + $0x1d8] sm:$0xf0]  ;;  %v204_v14 = vmul.f32 %v1537_v50, %v203_v5  ;;  %v912_v16 = vld [vmem:[#allocation5 + $0x48] sm:$0xf0]  ;;  %v1051_v22 = vor.u32 %v1182_v7, %v1048_v8 }
  0x50   : > { %663 = vmatpush.bf16.msra.mxu3 %v1071_v41  ;;  %v1164_v17 = vld [vmem:[#allocation5 + $0xc4] sm:$0xf]  ;;  %v976_v18 = vld [vmem:[#allocation5 + $0xc8] sm:$0xf0]  ;;  %v1115_v27 = vor.u32 %v1198_v11, %v1112_v12  ;;  %v915_v34 = vor.u32 %v1148_v13, %v912_v16  ;;  %v1146_v39 = vld [vmem:[#allocation5 + $0x34] sm:$0xf] }
  0x51   : > { %669 = vmatpush.bf16.msrb.mxu0 %v939_v42  ;;  %v190_v19 = vrot.slane %v189_v9, 2  ;;  %v197_v20 = vrot.slane %v196_v10, 2  ;;  %v1180_v23 = vld [vmem:[#allocation5 + $0x144] sm:$0xf]  ;;  %v1040_v24 = vld [vmem:[#allocation5 + $0x148] sm:$0xf0]  ;;  %v205_v26 = vadd.f32 %v1537_v50, %v204_v14  ;;  %v979_v37 = vor.u32 %v1164_v17, %v976_v18 }
  0x52   : > { %682 = vmatpush.bf16.msrb.mxu1 %v1003_v45  ;;  %v1196_v28 = vld [vmem:[#allocation5 + $0x1c4] sm:$0xf]  ;;  %v1104_v29 = vld [vmem:[#allocation5 + $0x1c8] sm:$0xf0]  ;;  %v1043_v38 = vor.u32 %v1180_v23, %v1040_v24  ;;  %v904_v44 = vld [vmem:[#allocation5 + $0x38] sm:$0xf0] }
  0x53   : > { %695 = vmatpush.bf16.msrb.mxu2 %v1067_v46  ;;  %v211_v30 = vld.sshfl [vmem:[#allocation1] sm:$0xff pattern:$0x75316420]  ;;  %v191_v31 = vadd.f32 %v190_v19, %v189_v9  ;;  %v212_v32 = vld.sshfl [vmem:[#allocation1 + $0x8] sm:$0xff pattern:$0x75316420]  ;;  %v198_v33 = vadd.f32 %v197_v20, %v196_v10  ;;  %v207_v45 = vsel %vm206_vm1, %v1537_v50, %v205_v26  ;;  %v1107_v46 = vor.u32 %v1196_v28, %v1104_v29 }
  0x54   : > { %708 = vmatpush.bf16.msrb.mxu3 %v1131_v51  ;;  %v215_v35 = vsel %vm186_vm0, %v211_v30, -inf  ;;  %v222_v36 = vsel %vm186_vm0, %v212_v32, -inf  ;;  %v1162_v47 = vld [vmem:[#allocation5 + $0xb4] sm:$0xf]  ;;  %v968_v48 = vld [vmem:[#allocation5 + $0xb8] sm:$0xf0]  ;;  %v907_v58 = vor.u32 %v1146_v39, %v904_v44 }
  0x55   : > { %670 = vmatpush.bf16.msrb.mxu0 %v931_v61  ;;  %v216_v40 = vrot.slane %v215_v35, 4  ;;  %v192_v41 = vrot.slane %v191_v31, 1  ;;  %v223_v42 = vrot.slane %v222_v36, 4  ;;  %v199_v43 = vrot.slane %v198_v33, 1  ;;  %v1178_v49 = vld [vmem:[#allocation5 + $0x134] sm:$0xf] }
  0x56   : > { %683 = vmatpush.bf16.msrb.mxu1 %v995_v0  ;;  %v1032_v55 = vld [vmem:[#allocation5 + $0x138] sm:$0xf0]  ;;  %v1194_v56 = vld [vmem:[#allocation5 + $0x1b4] sm:$0xf]  ;;  %v1144_v50 = vld [vmem:[#allocation5 + $0x24] sm:$0xf]  ;;  %v971_v0 = vor.u32 %v1162_v47, %v968_v48 }
  0x57   : > { %696 = vmatpush.bf16.msrb.mxu2 %v1059_v1  ;;  %v217_v51 = vmax.f32 %v215_v35, %v216_v40  ;;  %v193_v52 = vadd.f32 %v192_v41, %v191_v31  ;;  %v224_v53 = vmax.f32 %v222_v36, %v223_v42  ;;  %v200_v54 = vadd.f32 %v199_v43, %v198_v33  ;;  %v1096_v57 = vld [vmem:[#allocation5 + $0x1b8] sm:$0xf0]  ;;  %v896_v63 = vld [vmem:[#allocation5 + $0x28] sm:$0xf0]  ;;  %v1160_v3 = vld [vmem:[#allocation5 + $0xa4] sm:$0xf] }
  0x58   : > { %709 = vmatpush.bf16.msrb.mxu3 %v1123_v6  ;;  %v1035_v1 = vor.u32 %v1178_v49, %v1032_v55  ;;  %v1099_v2 = vor.u32 %v1194_v56, %v1096_v57  ;;  %v960_v8 = vld [vmem:[#allocation5 + $0xa8] sm:$0xf0]  ;;  %v1176_v9 = vld [vmem:[#allocation5 + $0x124] sm:$0xf]  ;;  %v899_v11 = vor.u32 %v1144_v50, %v896_v63  ;;  %v1142_v16 = vld [vmem:[#allocation5 + $0x14] sm:$0xf] }
  0x59   : > { %671 = vmatpush.bf16.msrb.mxu0 %v923_v15  ;;  %v218_v59 = vrot.slane %v217_v51, 2  ;;  %v208_v60 = vmul.f32 %v207_v45, %v193_v52  ;;  %v225_v61 = vrot.slane %v224_v53, 2  ;;  %v209_v62 = vmul.f32 %v207_v45, %v200_v54  ;;  %v1024_v10 = vld [vmem:[#allocation5 + $0x128] sm:$0xf0]  ;;  %v1192_v12 = vld [vmem:[#allocation5 + $0x1a4] sm:$0xf] }
  0x5a   : > { %684 = vmatpush.bf16.msrb.mxu1 %v987_v21  ;;  %v1088_v13 = vld [vmem:[#allocation5 + $0x1a8] sm:$0xf0]  ;;  %v888_v17 = vld [vmem:[#allocation5 + $0x18] sm:$0xf0]  ;;  %v963_v18 = vor.u32 %v1160_v3, %v960_v8  ;;  %v1027_v19 = vor.u32 %v1176_v9, %v1024_v10  ;;  %v1158_v20 = vld [vmem:[#allocation5 + $0x94] sm:$0xf] }
  0x5b   : > { %697 = vmatpush.bf16.msrb.mxu2 %v1051_v22  ;;  %v219_v4 = vmax.f32 %v217_v51, %v218_v59  ;;  %v229_v5 = vpack.c.bf16 %v208_v60, %v208_v60  ;;  %v226_v6 = vmax.f32 %v224_v53, %v225_v61  ;;  %v230_v7 = vpack.c.bf16 %v209_v62, %v209_v62  ;;  %v952_v23 = vld [vmem:[#allocation5 + $0x98] sm:$0xf0]  ;;  %v1174_v24 = vld [vmem:[#allocation5 + $0x114] sm:$0xf]  ;;  %v1140_v33 = vld [vmem:[#allocation5 + $0x4] sm:$0xf] }
  0x5c   : > { %710 = vmatpush.bf16.msrb.mxu3 %v1115_v27  ;;  %v1016_v26 = vld [vmem:[#allocation5 + $0x118] sm:$0xf0]  ;;  %v1091_v27 = vor.u32 %v1192_v12, %v1088_v13  ;;  %v891_v28 = vor.u32 %v1142_v16, %v888_v17  ;;  %v1190_v29 = vld [vmem:[#allocation5 + $0x194] sm:$0xf]  ;;  %v955_v35 = vor.u32 %v1158_v20, %v952_v23  ;;  %v1172_v39 = vld [vmem:[#allocation5 + $0x104] sm:$0xf] }
  0x5d   : > { %672 = vmatpush.bf16.msrb.mxu0 %v915_v34  ;;  %v220_v14 = vrot.slane %v219_v4, 1  ;;  %v227_v15 = vrot.slane %v226_v6, 1  ;;  %638 = vmatmul.bf16.vlgmr.msra.gmra.mxu1 %v230_v7  ;;  %v1080_v32 = vld [vmem:[#allocation5 + $0x198] sm:$0xf0]  ;;  %v880_v34 = vld [vmem:[#allocation5 + $0x8] sm:$0xf0]  ;;  %v1019_v36 = vor.u32 %v1174_v24, %v1016_v26 }
  0x5e   : > { %685 = vmatpush.bf16.msrb.mxu1 %v979_v37  ;;  %625 = vmatmul.bf16.vlgmr.msra.gmra.mxu0 %v229_v5  ;;  %v1156_v37 = vld [vmem:[#allocation5 + $0x84] sm:$0xf]  ;;  %v1008_v40 = vld [vmem:[#allocation5 + $0x108] sm:$0xf0]  ;;  %v1083_v41 = vor.u32 %v1190_v29, %v1080_v32  ;;  %v883_v42 = vor.u32 %v1140_v33, %v880_v34  ;;  %s784_s15 = sshll.u32 %s780_s8, 4  ;;  %s769_s16 = scalar_lea.sflag [#allocation4], %s1517_s29  ;;  %s785_s15 = int_to_ptr.hbm [resolvable:$true] %s784_s15 }
  0x5f   : > { %698 = vmatpush.bf16.msrb.mxu2 %v1043_v38  ;;  %v221_v21 = vmax.f32 %v219_v4, %v220_v14  ;;  %v228_v22 = vmax.f32 %v226_v6, %v227_v15  ;;  %v944_v38 = vld [vmem:[#allocation5 + $0x88] sm:$0xf0]  ;;  %v1188_v43 = vld [vmem:[#allocation5 + $0x184] sm:$0xf]  ;;  %s1349_s18 = sshra.s32 %s785_s15, 4  ;;  %s1355_s22 = scalar_lea.hbm %s1596_s2, 16  ;;  %s1350_s18 = int_to_ptr.hbm [resolvable:$true] %s1349_s18 }
  0x60   : > { %711 = vmatpush.bf16.msrb.mxu3 %v1107_v46  ;;  %v1072_v44 = vld [vmem:[#allocation5 + $0x188] sm:$0xf0]  ;;  %v947_v45 = vor.u32 %v1156_v37, %v944_v38  ;;  %v1011_v46 = vor.u32 %v1172_v39, %v1008_v40  ;;  %s1351_s19 = scalar_lea.hbm %s1350_s18, 8  ;;  %p1356_p12 = scmp.lt.s32.totalorder %s1350_s18, %s1596_s2 }
  0x61   : > { %673 = vmatpush.bf16.msrb.mxu0 %v907_v58  ;;  %v231_v30 = vpack.c.bf16 %v221_v21, %v221_v21  ;;  %v232_v31 = vpack.c.bf16 %v228_v22, %v228_v22  ;;  %v1075_v47 = vor.u32 %v1188_v43, %v1072_v44  ;;  %p1352_p1 = scmp.ne.s32.totalorder %s1350_s18, %s1351_s19  ;;  %p1357_p8 = scmp.lt.s32.totalorder %s1355_s22, %s1351_s19 }
  0x62   : > { %686 = vmatpush.bf16.msrb.mxu1 %v971_v0 }
  0x63   : > { %699 = vmatpush.bf16.msrb.mxu2 %v1035_v1  ;;  %664 = vmatmul.bf16.vlgmr.msra.gmra.mxu3 %v232_v31  ;;  %p1353_p3 = pnand %p1352_p1, %p1486_p13  ;;  %p1358_p7 = por %p1357_p8, %p1356_p12 }
  0x64   : > { %712 = vmatpush.bf16.msrb.mxu3 %v1099_v2  ;;  %651 = vmatmul.bf16.vlgmr.msra.gmra.mxu2 %v231_v30 }
  0x65   : > { %674 = vmatpush.bf16.msrb.mxu0 %v899_v11  ;;  %p1354_p5 = pneg %p1353_p3 }
  0x66   : > { %687 = vmatpush.bf16.msrb.mxu1 %v963_v18 }
  0x67   : > { %700 = vmatpush.bf16.msrb.mxu2 %v1027_v19  ;;  %p1359_p9 = pnand %p1358_p7, %p1354_p5 }
  0x68   : > { %713 = vmatpush.bf16.msrb.mxu3 %v1091_v27 }
  0x69   : > { %675 = vmatpush.bf16.msrb.mxu0 %v891_v28 }
  0x6a   : > { %688 = vmatpush.bf16.msrb.mxu1 %v955_v35 }
  0x6b   : > { %701 = vmatpush.bf16.msrb.mxu2 %v1019_v36 }
  0x6c   : > { %714 = vmatpush.bf16.msrb.mxu3 %v1083_v41 }
  0x6d   : > { %676 = vmatpush.bf16.msrb.mxu0 %v883_v42 }
  0x6e   : > { %689 = vmatpush.bf16.msrb.mxu1 %v947_v45 }
  0x6f   : > { %702 = vmatpush.bf16.msrb.mxu2 %v1011_v46 }
  0x70   : > { %715 = vmatpush.bf16.msrb.mxu3 %v1075_v47  ;;  %677 = vmatmul.bf16.vlgmr.msrb.gmra.mxu0 %v229_v5 }
  0x71   : > { %690 = vmatmul.bf16.vlgmr.msrb.gmra.mxu1 %v230_v7 }
  0x73   : > { %716 = vmatmul.bf16.vlgmr.msrb.gmra.mxu3 %v232_v31 }
  0x74   : > { %703 = vmatmul.bf16.vlgmr.msrb.gmra.mxu2 %v231_v30 }
  0xda   : > { %v639_v49 = vpop.f32.mrf.mxu1 }
  0xdb   : > { %v626_v48 = vpop.f32.mrf.mxu0 }
  0xdc   : > { %v627_v51 = vadd.f32 -0.06219436, %v626_v48 }
  0xde   : > { %v640_v54 = vadd.f32 %v639_v49, %v627_v51 }
  0xe2   : > { %v641_v53 = vpop.f32.mrf.mxu1 }
  0xe3   : > { %v628_v52 = vpop.f32.mrf.mxu0 }
  0xe6   : > { %v665_v56 = vpop.f32.mrf.mxu3 }
  0xe7   : > { %v652_v55 = vpop.f32.mrf.mxu2 }
  0xe8   : > { %v653_v57 = vadd.f32 %v652_v55, %v640_v54 }
  0xea   : > { %v666_v58 = vadd.f32 %v665_v56, %v653_v57 }
  0xec   : > { %v1132_v61 = vmul.f32 -1.442695, %v666_v58 }
  0xed   : > { %v678_v59 = vpop.f32.mrf.mxu0 }
  0xee   : > { %v691_v60 = vpop.f32.mrf.mxu1  ;;  %1267 = vpow2.f32 %v1132_v61  ;;  %v667_v50 = vpop.f32.mrf.mxu3  ;;  %v679_v63 = vadd.f32 -0.06219436, %v678_v59 }
  0xef   : > { %v654_v62 = vpop.f32.mrf.mxu2 }
  0xf0   : > { %v692_v3 = vadd.f32 %v691_v60, %v679_v63 }
  0xf4   : > { %v1268_v2 = vpop.eup %1267 }
  0xf5   : > { %v680_v0 = vpop.f32.mrf.mxu0  ;;  %v727_v4 = vadd.f32 1.0, %v1268_v2 }
  0xf6   : > { %v693_v1 = vpop.f32.mrf.mxu1  ;;  %v717_v6 = vpop.f32.mrf.mxu3 }
  0xf7   : > { %v704_v5 = vpop.f32.mrf.mxu2  ;;  %1269 = vrcp.f32 %v727_v4  ;;  %vm734_vm2 = vweird.f32 %v727_v4  ;;  %v740_v20 = vand.u32 2147483648, %v727_v4  ;;  %v738_v22 = vand.u32 2147483647, %v727_v4 }
  0xf8   : > { %v705_v7 = vadd.f32 %v704_v5, %v692_v3 }
  0xf9   : > { %v741_v29 = vor.u32 1.1754944e-38, %v740_v20  ;;  %vm739_vm6 = vcmp.eq.f32.partialorder %v738_v22, 8.507059e+37 }
  0xfa   : > { %v718_v8 = vadd.f32 %v717_v6, %v705_v7 }
  0xfc   : > { %v1133_v9 = vmul.f32 -1.442695, %v718_v8 }
  0xfd   : > { %v1270_v12 = vpop.eup %1269 }
  0xfe   : > { %1271 = vpow2.f32 %v1133_v9  ;;  %v719_v11 = vpop.f32.mrf.mxu3  ;;  %v730_v14 = vmul.f32 %v1270_v12, %v727_v4  ;;  %vm735_vm3 = vweird.f32 %v1270_v12 }
  0xff   : > { %v706_v10 = vpop.f32.mrf.mxu2  ;;  %vm1551_vm4 = vmor %vm734_vm2, %vm735_vm3 }
 0x100   : > { %v731_v16 = vsub.f32 1.0, %v730_v14 }
 0x102   : > { %v732_v17 = vmul.f32 %v1270_v12, %v731_v16 }
 0x104   : > { %v1272_v13 = vpop.eup %1271  ;;  %v733_v21 = vadd.f32 %v1270_v12, %v732_v17 }
 0x105   : > { %v728_v15 = vadd.f32 1.0, %v1272_v13 }
 0x106   : > { %v737_v31 = vsel %vm1551_vm4, %v1270_v12, %v733_v21 }
 0x107   : > { %1273 = vrcp.f32 %v728_v15  ;;  %v755_v26 = vand.u32 2147483648, %v728_v15  ;;  %v753_v28 = vand.u32 2147483647, %v728_v15  ;;  %vm749_vm7 = vweird.f32 %v728_v15 }
 0x108   : > { %v742_v34 = vsel %vm739_vm6, %v741_v29, %v737_v31 }
 0x109   : > { %v756_v32 = vor.u32 1.1754944e-38, %v755_v26  ;;  %vm754_vm9 = vcmp.eq.f32.partialorder %v753_v28, 8.507059e+37  ;;  %v759_v37 = vperm.slane %v742_v34, 0 }
 0x10d   : > { %v1274_v18 = vpop.eup %1273 }
 0x10e   : > { %v745_v19 = vmul.f32 %v1274_v18, %v728_v15  ;;  %vm750_vm5 = vweird.f32 %v1274_v18 }
 0x10f   : > { %vm751_vm8 = vmor %vm749_vm7, %vm750_vm5 }
 0x110   : > { %v746_v23 = vsub.f32 1.0, %v745_v19 }
 0x112   : > { %v747_v27 = vmul.f32 %v1274_v18, %v746_v23 }
 0x114   : > { %v748_v30 = vadd.f32 %v1274_v18, %v747_v27 }
 0x116   : > { %v752_v33 = vsel %vm751_vm8, %v1274_v18, %v748_v30 }
 0x117   : > { %v757_v35 = vsel %vm754_vm9, %v756_v32, %v752_v33 }
 0x118   : > { %v760_v36 = vperm.slane %v757_v35, 0 }
 0x11a   : > { %v763_v38 = vrot.slane %v760_v36, 4 }
 0x11c   : > { %v764_v39 = vsel %vm186_vm0, %v759_v37, %v763_v38 }
 0x11d   : > { %v766_v40 = vmul.f32 %v764_v39, %v1534_v25 }
 0x11f   : > { %767 = vst [vmem:[%s178_s13] sm:$0xff] %v766_v40 }
 0x120   : > { %1362 = shalt.err (!%p1359_p9)
}
 0x121   : > { %1211 = dma.vmem_to_hbm [thread:$0]  (%p1486_p13), %s783_s14, 128, %s785_s15, %s769_s16  }
 0x122 PF: > { %s796_s3 = sand.u32 1, %s1393_s9   ;;  %p1604_p10 = scmp.ge.s32.totalorder %s1405_s12, 2 }
 0x123   : > { %s797_s29 = scalar_lea.sflag [#allocation4], %s796_s3 }
 0x124   : > { %p1222_p11 = pnand %p1604_p10, %p1491_p4 }
 0x126   : > { %p1223_p0 = pneg %p1222_p11 }
 0x128   : > { %1388 = dma.done.wait (%p1223_p0), %s797_s29, 128  }
 0x129   : > { %1390 = vsyncadd (%p1223_p0), %s797_s29, 4294967168  ;;  %p16_p2 = scmp.ge.s32.totalorder %s1466_s23, 4   ;;  %s1605_s9 = smov %s1397_s10 }
 0x12a   : > { %s1606_s10 = smov %s1401_s11  ;;  %s1607_s11 = smov %s1478_s26 }
 0x12b   : > { %s1608_s12 = smov %s1466_s23  ;;  %18 = sbr.rel (!%p16_p2) target bundleno = 6 (0x6), region = 77 }
 0x130   :  { %803 = vsyncpa [#allocation3], 1 }
 0x131   :  { %805 = vsyncpa [#allocation3 + $0x1], 1 }
 0x132   :  { %806 = vsyncpa [#allocation6], 1 }
 0x133   :  { %807 = vsyncpa [#allocation4], 1 }
 0x134   :  { %809 = vsyncpa [#allocation4 + $0x1], 1 }

</bundles_post_ra>
